<compile_context>
chip_gen: v7x
topology: tpu7x:2x2x1
jax: 0.10.0
libtpu: 0.0.40
codegen_flags: <defaults>
</compile_context>

<pallas_src>
import jax
import jax.numpy as jnp
from jax import lax
from jax.experimental import pallas as pl
from jax.experimental.pallas import tpu as pltpu


def _make_mlp_kernel(n_layers: int, ln_eps: float = 1e-5):
    """Fused kernel: n_layers x (Linear + LayerNorm + ReLU) then classifier Linear."""

    def kernel(x_ref, *refs):
        # refs = (W0..W_{L-1}, aux, Wc, bc, out)
        out_ref = refs[-1]
        w_refs = refs[:n_layers]
        aux_ref = refs[n_layers]          # (3*n_layers, n_hidden) f32: [b; g; beta] per layer
        wc_ref = refs[n_layers + 1]       # (n_hidden, n_output) bf16
        bc_ref = refs[n_layers + 2]       # (1, n_output) f32

        aux = aux_ref[...]                # already f32 — no cast
        h = x_ref[...]                    # bf16: goes straight to the MXU for layer 0

        for i in range(n_layers):         # Python-unrolled (n_layers is static & small)
            w = w_refs[i][...]                       # bf16 (n_in, n_out), pre-transposed
            b = aux[3 * i][None, :]
            g = aux[3 * i + 1][None, :]
            beta = aux[3 * i + 2][None, :]

            # Linear on the MXU: bf16 inputs, f32 accumulate.
            h = jnp.dot(h, w, preferred_element_type=jnp.float32) + b

            # LayerNorm over features, one-pass stats, f32 math.  Clamp the
            # one-pass variance: E[h^2] - mean^2 can cancel to a tiny negative.
            mean = jnp.mean(h, axis=-1, keepdims=True)
            mean_sq = jnp.mean(h * h, axis=-1, keepdims=True)
            var = jnp.maximum(mean_sq - mean * mean, 0.0)
            h = (h - mean) * lax.rsqrt(var + ln_eps) * g + beta

            # ReLU, then bf16 for the next MXU matmul.
            h = jnp.maximum(h, 0.0).astype(jnp.bfloat16)

            # TODO(synk): Dropout omitted — rate 0.0 means the PyTorch module
            # never creates a Dropout layer (identity at inference anyway).

        y = jnp.dot(h, wc_ref[...], preferred_element_type=jnp.float32) + bc_ref[...]
        out_ref[...] = y.astype(out_ref.dtype)

    return kernel


def mlp_forward(x, ws, aux, wc, bc, *, block_m: int = 1024, ln_eps: float = 1e-5):
    """Fused MLP forward.

    x  : (batch, n_input), preferably bf16 (cast at the producer)
    ws : list of bf16 weights, pre-transposed to (n_in, n_out)
    aux: (3*n_layers, n_hidden) f32 packed [bias; ln_gamma; ln_beta] per layer
    wc : (n_hidden, n_output) bf16 classifier weight (pre-transposed)
    bc : (1, n_output) f32 classifier bias
    """
    batch, n_input = x.shape
    n_layers = len(ws)
    n_output = wc.shape[1]

    if x.dtype != jnp.bfloat16:
        # Layer 0 truncates to bf16 before the MXU anyway; prefer casting at
        # the producer so this copy never materializes.
        x = x.astype(jnp.bfloat16)

    block_m = min(block_m, batch)

    # Production path: batch % block_m == 0 -> zero pad / slice copies.
    padded = (batch % block_m) != 0
    if padded:
        # Ragged fallback only: padded rows produce garbage and are sliced off.
        b_pad = pl.cdiv(batch, block_m) * block_m
        x = jnp.pad(x, ((0, b_pad - batch), (0, 0)))
    else:
        b_pad = batch

    grid = (b_pad // block_m,)

    # VMEM budget: double-buffered activation tiles + single-buffered residents.
    bytes_tiles = 2 * block_m * (n_input * 2 + n_output * 4)
    bytes_resident = (sum(int(w.size) * 2 for w in ws)
                      + int(aux.size) * 4 + int(wc.size) * 2 + int(bc.size) * 4)
    vmem_limit = max(4 * 1024 * 1024, 2 * (bytes_tiles + bytes_resident))
    vmem_limit = min(vmem_limit, 64 * 1024 * 1024)   # v7x physical ceiling

    def _build(resident_buffers):
        def _resident(arr):
            kwargs = {}
            if resident_buffers is not None:
                kwargs["pipeline_mode"] = pl.Buffered(resident_buffers)
            return pl.BlockSpec(arr.shape, lambda i: (0,) * arr.ndim, **kwargs)

        in_specs = (
            [pl.BlockSpec((block_m, n_input), lambda i: (i, 0))]
            + [_resident(w) for w in ws]
            + [_resident(aux), _resident(wc), _resident(bc)]
        )
        out_spec = pl.BlockSpec((block_m, n_output), lambda i: (i, 0))

        return pl.pallas_call(
            _make_mlp_kernel(n_layers, ln_eps),
            out_shape=jax.ShapeDtypeStruct((b_pad, n_output), jnp.float32),
            grid=grid,
            in_specs=in_specs,
            out_specs=out_spec,
            compiler_params=pltpu.CompilerParams(
                dimension_semantics=("parallel",),  # batch tiles split across TCs (v7x)
                vmem_limit_bytes=int(vmem_limit),
            ),
        )

    try:
        out = _build(1)(x, *ws, aux, wc, bc)          # single-buffer resident operands
    except Exception:
        # TODO(synk): some jax versions reject single-buffered constant-index
        # operands; fall back to default double-buffering (correctness first).
        out = _build(None)(x, *ws, aux, wc, bc)

    return out[:batch] if padded else out


def init_params(key, n_input, n_hidden, n_layers, n_output):
    """Deterministic synthetic init. Weights pre-transposed to (n_in, n_out), bf16."""
    ws, aux_rows = [], []
    dims = [n_input] + [n_hidden] * n_layers
    for n_in, n_out in zip(dims[:-1], dims[1:]):
        key, kw, kb = jax.random.split(key, 3)
        bound = 1.0 / float(n_in) ** 0.5
        w = jax.random.uniform(kw, (n_in, n_out), jnp.float32, -bound, bound)
        b = jax.random.uniform(kb, (n_out,), jnp.float32, -bound, bound)
        ws.append(w.astype(jnp.bfloat16))
        aux_rows += [b,
                     jnp.ones((n_out,), jnp.float32),    # LayerNorm weight
                     jnp.zeros((n_out,), jnp.float32)]   # LayerNorm bias
    key, kw, kb = jax.random.split(key, 3)
    bound = 1.0 / float(n_hidden) ** 0.5
    wc = jax.random.uniform(kw, (n_hidden, n_output), jnp.float32,
                            -bound, bound).astype(jnp.bfloat16)
    bc = jax.random.uniform(kb, (1, n_output), jnp.float32, -bound, bound)
    aux = jnp.stack(aux_rows, axis=0)                    # (3*n_layers, n_hidden)
    return ws, aux, wc, bc


def mlp_reference(x, ws, aux, wc, bc, ln_eps: float = 1e-5):
    """Pure-JAX reference (bf16 matmuls, f32 two-pass LayerNorm)."""
    h = x
    for i, w in enumerate(ws):
        b, g, beta = aux[3 * i], aux[3 * i + 1], aux[3 * i + 2]
        h = jnp.dot(h.astype(jnp.bfloat16), w, preferred_element_type=jnp.float32) + b
        mean = jnp.mean(h, axis=-1, keepdims=True)
        var = jnp.mean(jnp.square(h - mean), axis=-1, keepdims=True)
        h = (h - mean) * lax.rsqrt(var + ln_eps) * g + beta
        h = jnp.maximum(h, 0.0)
    return jnp.dot(h.astype(jnp.bfloat16), wc, preferred_element_type=jnp.float32) + bc


if __name__ == "__main__":
    n_input, n_hidden, n_layers, n_output = 32, 64, 2, 16
    batch = 512        # 4 batch tiles of 128 -> even split across v7x's 2 TCs
    block_m = 128      # production: sweep 1024 / 2048 / 4096

    key = jax.random.PRNGKey(0)
    key, kx = jax.random.split(key)
    # Cast at the producer: layer 0 uses bf16 on the MXU either way, and this
    # halves the kernel's input HBM read.
    x = jax.random.normal(kx, (batch, n_input), jnp.float32).astype(jnp.bfloat16)

    ws, aux, wc, bc = init_params(key, n_input, n_hidden, n_layers, n_output)

    y = mlp_forward(x, ws, aux, wc, bc, block_m=block_m)
    y = jax.block_until_ready(y)

    y_ref = mlp_reference(x, ws, aux, wc, bc)
    assert y.shape == (batch, n_output)
    assert y.dtype == jnp.float32
    assert jnp.allclose(y, y_ref, atol=2e-3, rtol=2e-3)

    print("KERNEL_OK")
</pallas_src>

<mosaic_0001>
module attributes {stable_mosaic.version = 11 : i64} {
  func.func @kernel(%arg0: i32, %arg1: memref<128x32xbf16, #tpu.memory_space<vmem>>, %arg2: memref<32x64xbf16, #tpu.memory_space<vmem>>, %arg3: memref<64x64xbf16, #tpu.memory_space<vmem>>, %arg4: memref<6x64xf32, #tpu.memory_space<vmem>>, %arg5: memref<64x16xbf16, #tpu.memory_space<vmem>>, %arg6: memref<1x16xf32, #tpu.memory_space<vmem>>, %arg7: memref<128x16xf32, #tpu.memory_space<vmem>>) attributes {dimension_semantics = [#tpu.dimension_semantics<parallel>], iteration_bounds = array<i64: 4>, scalar_prefetch = 0 : i64, scratch_operands = 0 : i64, tpu.core_type = #tpu.core_type<tc>, window_params = [{transform_indices = @transform_0, window_bounds = array<i64: 128, 32>}, {pipeline_mode = #tpu.pipeline_mode<synchronous>, transform_indices = @transform_1, window_bounds = array<i64: 32, 64>}, {pipeline_mode = #tpu.pipeline_mode<synchronous>, transform_indices = @transform_2, window_bounds = array<i64: 64, 64>}, {pipeline_mode = #tpu.pipeline_mode<synchronous>, transform_indices = @transform_3, window_bounds = array<i64: 6, 64>}, {pipeline_mode = #tpu.pipeline_mode<synchronous>, transform_indices = @transform_4, window_bounds = array<i64: 64, 16>}, {pipeline_mode = #tpu.pipeline_mode<synchronous>, transform_indices = @transform_5, window_bounds = array<i64: 1, 16>}, {transform_indices = @transform_6, window_bounds = array<i64: 128, 16>}]} {
    %c0 = arith.constant 0 : index
    %c0_0 = arith.constant 0 : index
    %0 = vector.load %arg4[%c0, %c0_0] : memref<6x64xf32, #tpu.memory_space<vmem>>, vector<6x64xf32>
    %c0_1 = arith.constant 0 : index
    %c0_2 = arith.constant 0 : index
    %1 = vector.load %arg1[%c0_1, %c0_2] : memref<128x32xbf16, #tpu.memory_space<vmem>>, vector<128x32xbf16>
    %c0_3 = arith.constant 0 : index
    %c0_4 = arith.constant 0 : index
    %2 = vector.load %arg2[%c0_3, %c0_4] : memref<32x64xbf16, #tpu.memory_space<vmem>>, vector<32x64xbf16>
    %3 = vector.extract_strided_slice %0 {offsets = [0, 0], sizes = [1, 64], strides = [1, 1]} : vector<6x64xf32> to vector<1x64xf32>
    %4 = vector.shape_cast %3 : vector<1x64xf32> to vector<64xf32>
    %5 = vector.shape_cast %4 : vector<64xf32> to vector<1x64xf32>
    %6 = vector.extract_strided_slice %0 {offsets = [1, 0], sizes = [1, 64], strides = [1, 1]} : vector<6x64xf32> to vector<1x64xf32>
    %7 = vector.shape_cast %6 : vector<1x64xf32> to vector<64xf32>
    %8 = vector.shape_cast %7 : vector<64xf32> to vector<1x64xf32>
    %9 = vector.extract_strided_slice %0 {offsets = [2, 0], sizes = [1, 64], strides = [1, 1]} : vector<6x64xf32> to vector<1x64xf32>
    %10 = vector.shape_cast %9 : vector<1x64xf32> to vector<64xf32>
    %11 = vector.shape_cast %10 : vector<64xf32> to vector<1x64xf32>
    %cst = arith.constant dense<0.000000e+00> : vector<128x64xf32>
    %12 = tpu.matmul %1, %2, %cst {dimension_numbers = #tpu.dot_dimension_numbers<[1], [0], [0], [1], [0, 0, 1, 1], [], []>} : vector<128x32xbf16>, vector<32x64xbf16>, vector<128x64xf32> -> vector<128x64xf32>
    %13 = vector.broadcast %5 : vector<1x64xf32> to vector<128x64xf32>
    %14 = arith.addf %12, %13 : vector<128x64xf32>
    %cst_5 = arith.constant dense<0.000000e+00> : vector<128xf32>
    %15 = vector.multi_reduction <add>, %14, %cst_5 [1] : vector<128x64xf32> to vector<128xf32>
    %16 = vector.shape_cast %15 : vector<128xf32> to vector<128x1xf32>
    %cst_6 = arith.constant 6.400000e+01 : f32
    %17 = vector.broadcast %cst_6 : f32 to vector<128x1xf32>
    %18 = arith.divf %16, %17 : vector<128x1xf32>
    %19 = arith.mulf %14, %14 : vector<128x64xf32>
    %cst_7 = arith.constant dense<0.000000e+00> : vector<128xf32>
    %20 = vector.multi_reduction <add>, %19, %cst_7 [1] : vector<128x64xf32> to vector<128xf32>
    %21 = vector.shape_cast %20 : vector<128xf32> to vector<128x1xf32>
    %cst_8 = arith.constant 6.400000e+01 : f32
    %22 = vector.broadcast %cst_8 : f32 to vector<128x1xf32>
    %23 = arith.divf %21, %22 : vector<128x1xf32>
    %24 = arith.mulf %18, %18 : vector<128x1xf32>
    %25 = arith.subf %23, %24 : vector<128x1xf32>
    %cst_9 = arith.constant 0.000000e+00 : f32
    %26 = vector.broadcast %cst_9 : f32 to vector<128x1xf32>
    %27 = arith.maximumf %25, %26 : vector<128x1xf32>
    %28 = vector.broadcast %18 : vector<128x1xf32> to vector<128x64xf32>
    %29 = arith.subf %14, %28 : vector<128x64xf32>
    %cst_10 = arith.constant 9.99999974E-6 : f32
    %30 = vector.broadcast %cst_10 : f32 to vector<128x1xf32>
    %31 = arith.addf %27, %30 : vector<128x1xf32>
    %32 = math.rsqrt %31 : vector<128x1xf32>
    %33 = vector.broadcast %32 : vector<128x1xf32> to vector<128x64xf32>
    %34 = arith.mulf %29, %33 : vector<128x64xf32>
    %35 = vector.broadcast %8 : vector<1x64xf32> to vector<128x64xf32>
    %36 = arith.mulf %34, %35 : vector<128x64xf32>
    %37 = vector.broadcast %11 : vector<1x64xf32> to vector<128x64xf32>
    %38 = arith.addf %36, %37 : vector<128x64xf32>
    %cst_11 = arith.constant 0.000000e+00 : f32
    %39 = vector.broadcast %cst_11 : f32 to vector<128x64xf32>
    %40 = arith.maximumf %38, %39 : vector<128x64xf32>
    %41 = arith.truncf %40 : vector<128x64xf32> to vector<128x64xbf16>
    %c0_12 = arith.constant 0 : index
    %c0_13 = arith.constant 0 : index
    %42 = vector.load %arg3[%c0_12, %c0_13] : memref<64x64xbf16, #tpu.memory_space<vmem>>, vector<64x64xbf16>
    %43 = vector.extract_strided_slice %0 {offsets = [3, 0], sizes = [1, 64], strides = [1, 1]} : vector<6x64xf32> to vector<1x64xf32>
    %44 = vector.shape_cast %43 : vector<1x64xf32> to vector<64xf32>
    %45 = vector.shape_cast %44 : vector<64xf32> to vector<1x64xf32>
    %46 = vector.extract_strided_slice %0 {offsets = [4, 0], sizes = [1, 64], strides = [1, 1]} : vector<6x64xf32> to vector<1x64xf32>
    %47 = vector.shape_cast %46 : vector<1x64xf32> to vector<64xf32>
    %48 = vector.shape_cast %47 : vector<64xf32> to vector<1x64xf32>
    %49 = vector.extract_strided_slice %0 {offsets = [5, 0], sizes = [1, 64], strides = [1, 1]} : vector<6x64xf32> to vector<1x64xf32>
    %50 = vector.shape_cast %49 : vector<1x64xf32> to vector<64xf32>
    %51 = vector.shape_cast %50 : vector<64xf32> to vector<1x64xf32>
    %cst_14 = arith.constant dense<0.000000e+00> : vector<128x64xf32>
    %52 = tpu.matmul %41, %42, %cst_14 {dimension_numbers = #tpu.dot_dimension_numbers<[1], [0], [0], [1], [0, 0, 1, 1], [], []>} : vector<128x64xbf16>, vector<64x64xbf16>, vector<128x64xf32> -> vector<128x64xf32>
    %53 = vector.broadcast %45 : vector<1x64xf32> to vector<128x64xf32>
    %54 = arith.addf %52, %53 : vector<128x64xf32>
    %cst_15 = arith.constant dense<0.000000e+00> : vector<128xf32>
    %55 = vector.multi_reduction <add>, %54, %cst_15 [1] : vector<128x64xf32> to vector<128xf32>
    %56 = vector.shape_cast %55 : vector<128xf32> to vector<128x1xf32>
    %cst_16 = arith.constant 6.400000e+01 : f32
    %57 = vector.broadcast %cst_16 : f32 to vector<128x1xf32>
    %58 = arith.divf %56, %57 : vector<128x1xf32>
    %59 = arith.mulf %54, %54 : vector<128x64xf32>
    %cst_17 = arith.constant dense<0.000000e+00> : vector<128xf32>
    %60 = vector.multi_reduction <add>, %59, %cst_17 [1] : vector<128x64xf32> to vector<128xf32>
    %61 = vector.shape_cast %60 : vector<128xf32> to vector<128x1xf32>
    %cst_18 = arith.constant 6.400000e+01 : f32
    %62 = vector.broadcast %cst_18 : f32 to vector<128x1xf32>
    %63 = arith.divf %61, %62 : vector<128x1xf32>
    %64 = arith.mulf %58, %58 : vector<128x1xf32>
    %65 = arith.subf %63, %64 : vector<128x1xf32>
    %cst_19 = arith.constant 0.000000e+00 : f32
    %66 = vector.broadcast %cst_19 : f32 to vector<128x1xf32>
    %67 = arith.maximumf %65, %66 : vector<128x1xf32>
    %68 = vector.broadcast %58 : vector<128x1xf32> to vector<128x64xf32>
    %69 = arith.subf %54, %68 : vector<128x64xf32>
    %cst_20 = arith.constant 9.99999974E-6 : f32
    %70 = vector.broadcast %cst_20 : f32 to vector<128x1xf32>
    %71 = arith.addf %67, %70 : vector<128x1xf32>
    %72 = math.rsqrt %71 : vector<128x1xf32>
    %73 = vector.broadcast %72 : vector<128x1xf32> to vector<128x64xf32>
    %74 = arith.mulf %69, %73 : vector<128x64xf32>
    %75 = vector.broadcast %48 : vector<1x64xf32> to vector<128x64xf32>
    %76 = arith.mulf %74, %75 : vector<128x64xf32>
    %77 = vector.broadcast %51 : vector<1x64xf32> to vector<128x64xf32>
    %78 = arith.addf %76, %77 : vector<128x64xf32>
    %cst_21 = arith.constant 0.000000e+00 : f32
    %79 = vector.broadcast %cst_21 : f32 to vector<128x64xf32>
    %80 = arith.maximumf %78, %79 : vector<128x64xf32>
    %81 = arith.truncf %80 : vector<128x64xf32> to vector<128x64xbf16>
    %c0_22 = arith.constant 0 : index
    %c0_23 = arith.constant 0 : index
    %82 = vector.load %arg5[%c0_22, %c0_23] : memref<64x16xbf16, #tpu.memory_space<vmem>>, vector<64x16xbf16>
    %cst_24 = arith.constant dense<0.000000e+00> : vector<128x16xf32>
    %83 = tpu.matmul %81, %82, %cst_24 {dimension_numbers = #tpu.dot_dimension_numbers<[1], [0], [0], [1], [0, 0, 1, 1], [], []>} : vector<128x64xbf16>, vector<64x16xbf16>, vector<128x16xf32> -> vector<128x16xf32>
    %c0_25 = arith.constant 0 : index
    %c0_26 = arith.constant 0 : index
    %84 = vector.load %arg6[%c0_25, %c0_26] : memref<1x16xf32, #tpu.memory_space<vmem>>, vector<1x16xf32>
    %85 = vector.broadcast %84 : vector<1x16xf32> to vector<128x16xf32>
    %86 = arith.addf %83, %85 : vector<128x16xf32>
    %c0_27 = arith.constant 0 : index
    %c0_28 = arith.constant 0 : index
    %87 = vector.load %arg7[%c0_27, %c0_28] : memref<128x16xf32, #tpu.memory_space<vmem>>, vector<128x16xf32>
    tpu.vector_store %arg7[%c0_27, %c0_28], %86 {strides = array<i32>} : memref<128x16xf32, #tpu.memory_space<vmem>>, vector<128x16xf32>,
    return
  }
  func.func @transform_0(%arg0: i32) -> (i32, i32) {
    %c0_i32 = arith.constant 0 : i32
    %c0_i32_0 = arith.constant 0 : i32
    return %arg0, %c0_i32 : i32, i32
  }
  func.func @transform_1(%arg0: i32) -> (i32, i32) {
    %c0_i32 = arith.constant 0 : i32
    %c0_i32_0 = arith.constant 0 : i32
    %c0_i32_1 = arith.constant 0 : i32
    return %c0_i32, %c0_i32_0 : i32, i32
  }
  func.func @transform_2(%arg0: i32) -> (i32, i32) {
    %c0_i32 = arith.constant 0 : i32
    %c0_i32_0 = arith.constant 0 : i32
    %c0_i32_1 = arith.constant 0 : i32
    return %c0_i32, %c0_i32_0 : i32, i32
  }
  func.func @transform_3(%arg0: i32) -> (i32, i32) {
    %c0_i32 = arith.constant 0 : i32
    %c0_i32_0 = arith.constant 0 : i32
    %c0_i32_1 = arith.constant 0 : i32
    return %c0_i32, %c0_i32_0 : i32, i32
  }
  func.func @transform_4(%arg0: i32) -> (i32, i32) {
    %c0_i32 = arith.constant 0 : i32
    %c0_i32_0 = arith.constant 0 : i32
    %c0_i32_1 = arith.constant 0 : i32
    return %c0_i32, %c0_i32_0 : i32, i32
  }
  func.func @transform_5(%arg0: i32) -> (i32, i32) {
    %c0_i32 = arith.constant 0 : i32
    %c0_i32_0 = arith.constant 0 : i32
    %c0_i32_1 = arith.constant 0 : i32
    return %c0_i32, %c0_i32_0 : i32, i32
  }
  func.func @transform_6(%arg0: i32) -> (i32, i32) {
    %c0_i32 = arith.constant 0 : i32
    %c0_i32_0 = arith.constant 0 : i32
    return %arg0, %c0_i32 : i32, i32
  }
}

module attributes {stable_mosaic.version = 11 : i64} {
  func.func @kernel(%arg0: i32, %arg1: memref<128x32xbf16, #tpu.memory_space<vmem>>, %arg2: memref<32x64xbf16, #tpu.memory_space<vmem>>, %arg3: memref<64x64xbf16, #tpu.memory_space<vmem>>, %arg4: memref<6x64xf32, #tpu.memory_space<vmem>>, %arg5: memref<64x16xbf16, #tpu.memory_space<vmem>>, %arg6: memref<1x16xf32, #tpu.memory_space<vmem>>, %arg7: memref<128x16xf32, #tpu.memory_space<vmem>>) attributes {dimension_semantics = [#tpu.dimension_semantics<parallel>], iteration_bounds = array<i64: 4>, scalar_prefetch = 0 : i64, scratch_operands = 0 : i64, tpu.core_type = #tpu.core_type<tc>, window_params = [{transform_indices = @transform_0, window_bounds = array<i64: 128, 32>}, {pipeline_mode = #tpu.pipeline_mode<synchronous>, transform_indices = @transform_1, window_bounds = array<i64: 32, 64>}, {pipeline_mode = #tpu.pipeline_mode<synchronous>, transform_indices = @transform_2, window_bounds = array<i64: 64, 64>}, {pipeline_mode = #tpu.pipeline_mode<synchronous>, transform_indices = @transform_3, window_bounds = array<i64: 6, 64>}, {pipeline_mode = #tpu.pipeline_mode<synchronous>, transform_indices = @transform_4, window_bounds = array<i64: 64, 16>}, {pipeline_mode = #tpu.pipeline_mode<synchronous>, transform_indices = @transform_5, window_bounds = array<i64: 1, 16>}, {transform_indices = @transform_6, window_bounds = array<i64: 128, 16>}]} {
    %c0 = arith.constant 0 : index
    %c0_0 = arith.constant 0 : index
    %0 = vector.load %arg4[%c0, %c0_0] : memref<6x64xf32, #tpu.memory_space<vmem>>, vector<6x64xf32>
    %c0_1 = arith.constant 0 : index
    %c0_2 = arith.constant 0 : index
    %1 = vector.load %arg1[%c0_1, %c0_2] : memref<128x32xbf16, #tpu.memory_space<vmem>>, vector<128x32xbf16>
    %c0_3 = arith.constant 0 : index
    %c0_4 = arith.constant 0 : index
    %2 = vector.load %arg2[%c0_3, %c0_4] : memref<32x64xbf16, #tpu.memory_space<vmem>>, vector<32x64xbf16>
    %3 = vector.extract_strided_slice %0 {offsets = [0, 0], sizes = [1, 64], strides = [1, 1]} : vector<6x64xf32> to vector<1x64xf32>
    %4 = vector.shape_cast %3 : vector<1x64xf32> to vector<64xf32>
    %5 = vector.shape_cast %4 : vector<64xf32> to vector<1x64xf32>
    %6 = vector.extract_strided_slice %0 {offsets = [1, 0], sizes = [1, 64], strides = [1, 1]} : vector<6x64xf32> to vector<1x64xf32>
    %7 = vector.shape_cast %6 : vector<1x64xf32> to vector<64xf32>
    %8 = vector.shape_cast %7 : vector<64xf32> to vector<1x64xf32>
    %9 = vector.extract_strided_slice %0 {offsets = [2, 0], sizes = [1, 64], strides = [1, 1]} : vector<6x64xf32> to vector<1x64xf32>
    %10 = vector.shape_cast %9 : vector<1x64xf32> to vector<64xf32>
    %11 = vector.shape_cast %10 : vector<64xf32> to vector<1x64xf32>
    %cst = arith.constant dense<0.000000e+00> : vector<128x64xf32>
    %12 = tpu.matmul %1, %2, %cst {dimension_numbers = #tpu.dot_dimension_numbers<[1], [0], [0], [1], [0, 0, 1, 1], [], []>} : vector<128x32xbf16>, vector<32x64xbf16>, vector<128x64xf32> -> vector<128x64xf32>
    %13 = vector.broadcast %5 : vector<1x64xf32> to vector<128x64xf32>
    %14 = arith.addf %12, %13 : vector<128x64xf32>
    %cst_5 = arith.constant dense<0.000000e+00> : vector<128xf32>
    %15 = vector.multi_reduction <add>, %14, %cst_5 [1] : vector<128x64xf32> to vector<128xf32>
    %16 = vector.shape_cast %15 : vector<128xf32> to vector<128x1xf32>
    %cst_6 = arith.constant 6.400000e+01 : f32
    %17 = vector.broadcast %cst_6 : f32 to vector<128x1xf32>
    %18 = arith.divf %16, %17 : vector<128x1xf32>
    %19 = arith.mulf %14, %14 : vector<128x64xf32>
    %cst_7 = arith.constant dense<0.000000e+00> : vector<128xf32>
    %20 = vector.multi_reduction <add>, %19, %cst_7 [1] : vector<128x64xf32> to vector<128xf32>
    %21 = vector.shape_cast %20 : vector<128xf32> to vector<128x1xf32>
    %cst_8 = arith.constant 6.400000e+01 : f32
    %22 = vector.broadcast %cst_8 : f32 to vector<128x1xf32>
    %23 = arith.divf %21, %22 : vector<128x1xf32>
    %24 = arith.mulf %18, %18 : vector<128x1xf32>
    %25 = arith.subf %23, %24 : vector<128x1xf32>
    %cst_9 = arith.constant 0.000000e+00 : f32
    %26 = vector.broadcast %cst_9 : f32 to vector<128x1xf32>
    %27 = arith.maximumf %25, %26 : vector<128x1xf32>
    %28 = vector.broadcast %18 : vector<128x1xf32> to vector<128x64xf32>
    %29 = arith.subf %14, %28 : vector<128x64xf32>
    %cst_10 = arith.constant 9.99999974E-6 : f32
    %30 = vector.broadcast %cst_10 : f32 to vector<128x1xf32>
    %31 = arith.addf %27, %30 : vector<128x1xf32>
    %32 = math.rsqrt %31 : vector<128x1xf32>
    %33 = vector.broadcast %32 : vector<128x1xf32> to vector<128x64xf32>
    %34 = arith.mulf %29, %33 : vector<128x64xf32>
    %35 = vector.broadcast %8 : vector<1x64xf32> to vector<128x64xf32>
    %36 = arith.mulf %34, %35 : vector<128x64xf32>
    %37 = vector.broadcast %11 : vector<1x64xf32> to vector<128x64xf32>
    %38 = arith.addf %36, %37 : vector<128x64xf32>
    %cst_11 = arith.constant 0.000000e+00 : f32
    %39 = vector.broadcast %cst_11 : f32 to vector<128x64xf32>
    %40 = arith.maximumf %38, %39 : vector<128x64xf32>
    %41 = arith.truncf %40 : vector<128x64xf32> to vector<128x64xbf16>
    %c0_12 = arith.constant 0 : index
    %c0_13 = arith.constant 0 : index
    %42 = vector.load %arg3[%c0_12, %c0_13] : memref<64x64xbf16, #tpu.memory_space<vmem>>, vector<64x64xbf16>
    %43 = vector.extract_strided_slice %0 {offsets = [3, 0], sizes = [1, 64], strides = [1, 1]} : vector<6x64xf32> to vector<1x64xf32>
    %44 = vector.shape_cast %43 : vector<1x64xf32> to vector<64xf32>
    %45 = vector.shape_cast %44 : vector<64xf32> to vector<1x64xf32>
    %46 = vector.extract_strided_slice %0 {offsets = [4, 0], sizes = [1, 64], strides = [1, 1]} : vector<6x64xf32> to vector<1x64xf32>
    %47 = vector.shape_cast %46 : vector<1x64xf32> to vector<64xf32>
    %48 = vector.shape_cast %47 : vector<64xf32> to vector<1x64xf32>
    %49 = vector.extract_strided_slice %0 {offsets = [5, 0], sizes = [1, 64], strides = [1, 1]} : vector<6x64xf32> to vector<1x64xf32>
    %50 = vector.shape_cast %49 : vector<1x64xf32> to vector<64xf32>
    %51 = vector.shape_cast %50 : vector<64xf32> to vector<1x64xf32>
    %cst_14 = arith.constant dense<0.000000e+00> : vector<128x64xf32>
    %52 = tpu.matmul %41, %42, %cst_14 {dimension_numbers = #tpu.dot_dimension_numbers<[1], [0], [0], [1], [0, 0, 1, 1], [], []>} : vector<128x64xbf16>, vector<64x64xbf16>, vector<128x64xf32> -> vector<128x64xf32>
    %53 = vector.broadcast %45 : vector<1x64xf32> to vector<128x64xf32>
    %54 = arith.addf %52, %53 : vector<128x64xf32>
    %cst_15 = arith.constant dense<0.000000e+00> : vector<128xf32>
    %55 = vector.multi_reduction <add>, %54, %cst_15 [1] : vector<128x64xf32> to vector<128xf32>
    %56 = vector.shape_cast %55 : vector<128xf32> to vector<128x1xf32>
    %cst_16 = arith.constant 6.400000e+01 : f32
    %57 = vector.broadcast %cst_16 : f32 to vector<128x1xf32>
    %58 = arith.divf %56, %57 : vector<128x1xf32>
    %59 = arith.mulf %54, %54 : vector<128x64xf32>
    %cst_17 = arith.constant dense<0.000000e+00> : vector<128xf32>
    %60 = vector.multi_reduction <add>, %59, %cst_17 [1] : vector<128x64xf32> to vector<128xf32>
    %61 = vector.shape_cast %60 : vector<128xf32> to vector<128x1xf32>
    %cst_18 = arith.constant 6.400000e+01 : f32
    %62 = vector.broadcast %cst_18 : f32 to vector<128x1xf32>
    %63 = arith.divf %61, %62 : vector<128x1xf32>
    %64 = arith.mulf %58, %58 : vector<128x1xf32>
    %65 = arith.subf %63, %64 : vector<128x1xf32>
    %cst_19 = arith.constant 0.000000e+00 : f32
    %66 = vector.broadcast %cst_19 : f32 to vector<128x1xf32>
    %67 = arith.maximumf %65, %66 : vector<128x1xf32>
    %68 = vector.broadcast %58 : vector<128x1xf32> to vector<128x64xf32>
    %69 = arith.subf %54, %68 : vector<128x64xf32>
    %cst_20 = arith.constant 9.99999974E-6 : f32
    %70 = vector.broadcast %cst_20 : f32 to vector<128x1xf32>
    %71 = arith.addf %67, %70 : vector<128x1xf32>
    %72 = math.rsqrt %71 : vector<128x1xf32>
    %73 = vector.broadcast %72 : vector<128x1xf32> to vector<128x64xf32>
    %74 = arith.mulf %69, %73 : vector<128x64xf32>
    %75 = vector.broadcast %48 : vector<1x64xf32> to vector<128x64xf32>
    %76 = arith.mulf %74, %75 : vector<128x64xf32>
    %77 = vector.broadcast %51 : vector<1x64xf32> to vector<128x64xf32>
    %78 = arith.addf %76, %77 : vector<128x64xf32>
    %cst_21 = arith.constant 0.000000e+00 : f32
    %79 = vector.broadcast %cst_21 : f32 to vector<128x64xf32>
    %80 = arith.maximumf %78, %79 : vector<128x64xf32>
    %81 = arith.truncf %80 : vector<128x64xf32> to vector<128x64xbf16>
    %c0_22 = arith.constant 0 : index
    %c0_23 = arith.constant 0 : index
    %82 = vector.load %arg5[%c0_22, %c0_23] : memref<64x16xbf16, #tpu.memory_space<vmem>>, vector<64x16xbf16>
    %cst_24 = arith.constant dense<0.000000e+00> : vector<128x16xf32>
    %83 = tpu.matmul %81, %82, %cst_24 {dimension_numbers = #tpu.dot_dimension_numbers<[1], [0], [0], [1], [0, 0, 1, 1], [], []>} : vector<128x64xbf16>, vector<64x16xbf16>, vector<128x16xf32> -> vector<128x16xf32>
    %c0_25 = arith.constant 0 : index
    %c0_26 = arith.constant 0 : index
    %84 = vector.load %arg6[%c0_25, %c0_26] : memref<1x16xf32, #tpu.memory_space<vmem>>, vector<1x16xf32>
    %85 = vector.broadcast %84 : vector<1x16xf32> to vector<128x16xf32>
    %86 = arith.addf %83, %85 : vector<128x16xf32>
    %c0_27 = arith.constant 0 : index
    %c0_28 = arith.constant 0 : index
    %87 = vector.load %arg7[%c0_27, %c0_28] : memref<128x16xf32, #tpu.memory_space<vmem>>, vector<128x16xf32>
    tpu.vector_store %arg7[%c0_27, %c0_28], %86 {strides = array<i32>} : memref<128x16xf32, #tpu.memory_space<vmem>>, vector<128x16xf32>,
    return
  }
  func.func @transform_0(%arg0: i32) -> (i32, i32) {
    %c0_i32 = arith.constant 0 : i32
    %c0_i32_0 = arith.constant 0 : i32
    return %arg0, %c0_i32 : i32, i32
  }
  func.func @transform_1(%arg0: i32) -> (i32, i32) {
    %c0_i32 = arith.constant 0 : i32
    %c0_i32_0 = arith.constant 0 : i32
    %c0_i32_1 = arith.constant 0 : i32
    return %c0_i32, %c0_i32_0 : i32, i32
  }
  func.func @transform_2(%arg0: i32) -> (i32, i32) {
    %c0_i32 = arith.constant 0 : i32
    %c0_i32_0 = arith.constant 0 : i32
    %c0_i32_1 = arith.constant 0 : i32
    return %c0_i32, %c0_i32_0 : i32, i32
  }
  func.func @transform_3(%arg0: i32) -> (i32, i32) {
    %c0_i32 = arith.constant 0 : i32
    %c0_i32_0 = arith.constant 0 : i32
    %c0_i32_1 = arith.constant 0 : i32
    return %c0_i32, %c0_i32_0 : i32, i32
  }
  func.func @transform_4(%arg0: i32) -> (i32, i32) {
    %c0_i32 = arith.constant 0 : i32
    %c0_i32_0 = arith.constant 0 : i32
    %c0_i32_1 = arith.constant 0 : i32
    return %c0_i32, %c0_i32_0 : i32, i32
  }
  func.func @transform_5(%arg0: i32) -> (i32, i32) {
    %c0_i32 = arith.constant 0 : i32
    %c0_i32_0 = arith.constant 0 : i32
    %c0_i32_1 = arith.constant 0 : i32
    return %c0_i32, %c0_i32_0 : i32, i32
  }
  func.func @transform_6(%arg0: i32) -> (i32, i32) {
    %c0_i32 = arith.constant 0 : i32
    %c0_i32_0 = arith.constant 0 : i32
    return %arg0, %c0_i32 : i32, i32
  }
}

</mosaic_0001>

<bundles_post_ra>
// kernel: tpu_custom_call.1
= control target key start
LH: loop header
LB: loop body
LE: loop exit
PB: predicated region body
PF: predicated region fallthrough
CT: control target
= control target key end

     0   :  { %s1781_s21 = smov 0   ;;  %s2431_s0 = inlined_call_operand.vmem [shape: bf16[512,32], index: 0, kind: input, shape index: {}]   ;;  %s2432_s1 = inlined_call_operand.vmem [shape: bf16[32,64], index: 1, kind: input, shape index: {}]   ;;  %s2433_s2 = inlined_call_operand.vmem [shape: bf16[64,64], index: 2, kind: input, shape index: {}]   ;;  %s2434_s3 = inlined_call_operand.vmem [shape: f32[6,64], index: 3, kind: input, shape index: {}]   ;;  %s2435_s4 = inlined_call_operand.vmem [shape: bf16[64,16], index: 4, kind: input, shape index: {}]   ;;  %s2436_s5 = inlined_call_operand.vmem [shape: f32[1,16], index: 5, kind: input, shape index: {}]   ;;  %s2437_s6 = inlined_call_operand.vmem [shape: f32[512,16], index: 6, kind: output, shape index: {}]  }
   0x1 LB: > { %s1487_s22 = sadd.s32 4294967295, %s1744_s21   ;;  %p1491_p0 = scmp.ge.s32.totalorder %s1744_s21, 1  ;;  %s1744_s21 = sphi %s1781_s21, %s16_s21  }
   0x2   : > { %p213_p1 = scmp.lt.s32.totalorder %s1744_s21, 5 }
   0x4   : > { %p214_p2 = pnand %p1491_p0, %p213_p1 }
   0x5   : > { %v1655_v0 = vld [vmem:[%s2432_s1] sm:$0xff] (!%p214_p2)   ;;  %s1492_s25 = sshll.u32 (!%p214_p2), %s1487_s22, 4  ;;  %v1656_v1 = vld [vmem:[%s2432_s1 + $0x8] sm:$0xff] (!%p214_p2)   ;;  %vm333_vm0 = vcmask (!%p214_p2), 261120   ;;  %v277_v10 = vlaneseq (!%p214_p2)  ;;  %vm455_vm1 = vcmask (!%p214_p2), 523264   ;;  %vm1414_vm2 = vcmask (!%p214_p2), 130048  }
   0x6   : > { %217 = sbr.rel (%p214_p2) target bundleno = 1096 (0x448), region = 44  ;;  %p244_p3 = scmp.lt.s32.totalorder (!%p214_p2), %s1492_s25, 63  ;;  %1575 = vmatprep.subr.bf16.mxu0 (!%p214_p2), %v1655_v0  ;;  %1643 = vmatprep.subr.bf16.mxu1 (!%p214_p2), %v1655_v0  ;;  %v1815_v13 = vld [vmem:[%s2434_s3] sm:$0x3f] (!%p214_p2) }
   0x7   : > { %1576 = vmatpush3.bf16.msra.mxu0 (!%p214_p2), %v1655_v0  ;;  %1645 = vmatpush3.bf16.msra.mxu1 (!%p214_p2), %v1655_v0  ;;  %v1809_v11 = vshrl.u32 (!%p214_p2), %v277_v10, 7 }
   0x8   : > { %1577 = vmatprep.subr.bf16.mxu0 (!%p214_p2), %v1656_v1  ;;  %1644 = vmatprep.subr.bf16.mxu1 (!%p214_p2), %v1656_v1 }
   0x9   : > { %v279_v12 = vsub.s32 (!%p214_p2), 0, %v1809_v11 }
   0xb   : > { %1578 = vmatpush3.bf16.msra.mxu0 (!%p214_p2), %v1656_v1  ;;  %1646 = vmatpush3.bf16.msra.mxu1 (!%p214_p2), %v1656_v1  ;;  %v1818_v14 = vrot.slane (!%p214_p2), %v1815_v13, %v279_v12 }
   0xd   : > { %s2439_s25 = smov (!%p244_p3, %s1492_s25), 63 }
   0xe   : > { %s1493_s28 = sshll.u32 %s2439_s25, 2  ;;  %s1495_s30 = sshll.u32 %s2439_s25, 3 }
   0xf   : > { %s247_s7 = scalar_lea.vmem %s2431_s0, %s1493_s28  ;;  %s2394_s11 = scalar_lea.vmem %s2437_s6, %s1495_s30 }
  0x10   : > { %v1657_v2 = vld [vmem:[%s247_s7] sm:$0xff]   ;;  %v1659_v4 = vld [vmem:[%s247_s7 + $0x8] sm:$0xff]   ;;  %v1661_v6 = vld [vmem:[%s247_s7 + $0x10] sm:$0xff]  }
  0x11   : > { %v1658_v3 = vld [vmem:[%s247_s7 + $0x20] sm:$0xff]   ;;  %1579 = vmatprep.mubr.msk.bf16.mxu0 %vm333_vm0, %v1657_v2  ;;  %v1660_v5 = vld [vmem:[%s247_s7 + $0x28] sm:$0xff]   ;;  %v1662_v7 = vld [vmem:[%s247_s7 + $0x18] sm:$0xff]  }
  0x12   : > { %1587 = vmatprep.mubr.msk.bf16.mxu1 %vm333_vm0, %v1658_v3  ;;  %1580 = vmatmul.mubr.msk.bf16.vlgmr.msra.gmra.mrb[0].mxu0 %vm333_vm0, %v1659_v4  ;;  %v1663_v8 = vld [vmem:[%s247_s7 + $0x30] sm:$0xff]   ;;  %v1664_v9 = vld [vmem:[%s247_s7 + $0x38] sm:$0xff]  }
  0x13   : > { %1588 = vmatmul.mubr.msk.bf16.vlgmr.msra.gmra.mrb[0].mxu1 %vm333_vm0, %v1660_v5  ;;  %1583 = vmatprep.mubr.msk.bf16.mxu0 %vm333_vm0, %v1661_v6 }
  0x14   : > { %1591 = vmatprep.mubr.msk.bf16.mxu1 %vm333_vm0, %v1663_v8 }
  0x1a   : > { %1584 = vmatmul.mubr.msk.bf16.gmra.mrb[4].mxu0 %vm333_vm0, %v1662_v7 }
  0x1b   : > { %1592 = vmatmul.mubr.msk.bf16.gmra.mrb[4].mxu1 %vm333_vm0, %v1664_v9 }
  0xe5   : > { %v1581_v15 = vpop.f32.mrb[0].mxu0 }
  0xe6   : > { %v1821_v16 = vadd.f32 %v1581_v15, %v1818_v14  ;;  %v1589_v17 = vpop.f32.mrb[0].mxu1  ;;  %v392_v18 = vpop.f32.mrb[1].mxu0 }
  0xe7   : > { %v1824_v19 = vadd.f32 %v1589_v17, %v1818_v14  ;;  %v424_v20 = vpop.f32.mrb[1].mxu1  ;;  %v1582_v21 = vpop.f32.mrb[2].mxu0  ;;  %v1832_v26 = vadd.f32 %v392_v18, %v1818_v14 }
  0xe8   : > { %v1827_v22 = vadd.f32 %v1582_v21, %v1818_v14  ;;  %v1590_v23 = vpop.f32.mrb[2].mxu1  ;;  %v395_v24 = vpop.f32.mrb[3].mxu0  ;;  %v462_v25 = vsel %vm455_vm1, %v1821_v16, 0.0  ;;  %v1842_v31 = vadd.f32 %v424_v20, %v1818_v14  ;;  %v523_v43 = vmul.f32 %v1821_v16, %v1821_v16 }
  0xe9   : > { %v427_v27 = vpop.f32.mrb[3].mxu1  ;;  %v486_v28 = vsel %vm455_vm1, %v1824_v19, 0.0  ;;  %463 = vadd.xlane.f32.xlu1 %v462_v25  ;;  %v1837_v29 = vadd.f32 %v1590_v23, %v1818_v14  ;;  %v456_v32 = vsel %vm455_vm1, %v1832_v26, 0.0  ;;  %v1858_v45 = vadd.f32 %v395_v24, %v1818_v14 }
  0xea   : > { %487 = vadd.xlane.f32.xlu0 %v486_v28  ;;  %v465_v30 = vsel %vm455_vm1, %v1827_v22, 0.0  ;;  %v1849_v38 = vadd.f32 %v427_v27, %v1818_v14  ;;  %v480_v42 = vsel %vm455_vm1, %v1842_v31, 0.0  ;;  %v524_v47 = vmul.f32 %v1827_v22, %v1827_v22 }
  0xeb   : > { %v489_v39 = vsel %vm455_vm1, %v1837_v29, 0.0  ;;  %v543_v48 = vsel %vm455_vm1, %v523_v43, 0.0  ;;  %v522_v50 = vmul.f32 %v1858_v45, %v1858_v45  ;;  %v459_v51 = vsel %vm455_vm1, %v1858_v45, 0.0  ;;  %v1668_v43 = vld [vmem:[%s2433_s2 + $0x18] sm:$0xff]  }
  0xec   : > { %v483_v46 = vsel %vm455_vm1, %v1849_v38, 0.0  ;;  %v546_v49 = vsel %vm455_vm1, %v524_v47, 0.0  ;;  %v521_v52 = vmul.f32 %v1832_v26, %v1832_v26  ;;  %v530_v54 = vmul.f32 %v1849_v38, %v1849_v38 }
  0xed   : > { %466 = vadd.xlane.f32.xlu1 %v465_v30  ;;  %v1585_v33 = vpop.f32.mrb[4].mxu0  ;;  %v540_v53 = vsel %vm455_vm1, %v522_v50, 0.0  ;;  %v529_v56 = vmul.f32 %v1842_v31, %v1842_v31  ;;  %v532_v10 = vmul.f32 %v1837_v29, %v1837_v29  ;;  %v531_v15 = vmul.f32 %v1824_v19, %v1824_v19 }
  0xee   : > { %457 = vadd.xlane.f32.xlu0 %v456_v32  ;;  %v408_v34 = vpop.f32.mrb[5].mxu0  ;;  %v1846_v35 = vpop.f32.mrb[4].mxu1  ;;  %v537_v55 = vsel %vm455_vm1, %v521_v52, 0.0  ;;  %v564_v58 = vsel %vm455_vm1, %v530_v54, 0.0  ;;  %v1883_v59 = vadd.f32 %v1585_v33, %v1818_v14 }
  0xef   : > { %v1586_v36 = vpop.f32.mrb[6].mxu0  ;;  %v440_v37 = vpop.f32.mrb[5].mxu1  ;;  %v561_v60 = vsel %vm455_vm1, %v529_v56, 0.0  ;;  %v1892_v63 = vadd.f32 %v408_v34, %v1818_v14  ;;  %v570_v20 = vsel %vm455_vm1, %v532_v10, 0.0  ;;  %v567_v21 = vsel %vm455_vm1, %v531_v15, 0.0 }
  0xf0   : > { %v411_v40 = vpop.f32.mrb[7].mxu0  ;;  %v1594_v41 = vpop.f32.mrb[6].mxu1  ;;  %v1879_v57 = vadd.f32 %v1586_v36, %v1818_v14  ;;  %v474_v0 = vsel %vm455_vm1, %v1883_v59, 0.0  ;;  %v527_v4 = vmul.f32 %v1883_v59, %v1883_v59  ;;  %v1920_v18 = vadd.f32 %v440_v37, %v1818_v14 }
  0xf1   : > { %490 = vadd.xlane.f32.xlu1 %v489_v39  ;;  %v443_v44 = vpop.f32.mrb[7].mxu1  ;;  %v1887_v61 = vadd.f32 %v411_v40, %v1818_v14  ;;  %v468_v3 = vsel %vm455_vm1, %v1892_v63, 0.0  ;;  %v525_v8 = vmul.f32 %v1892_v63, %v1892_v63  ;;  %v1925_v23 = vadd.f32 %v1594_v41, %v1818_v14  ;;  %v1666_v39 = vld [vmem:[%s2433_s2 + $0x8] sm:$0xff]  }
  0xf2   : > { %481 = vadd.xlane.f32.xlu0 %v480_v42  ;;  %v477_v62 = vsel %vm455_vm1, %v1879_v57, 0.0  ;;  %v528_v2 = vmul.f32 %v1879_v57, %v1879_v57  ;;  %v555_v7 = vsel %vm455_vm1, %v527_v4, 0.0  ;;  %v1917_v17 = vadd.f32 %v443_v44, %v1818_v14  ;;  %v1667_v42 = vld [vmem:[%s2433_s2 + $0x10] sm:$0xff]  }
  0xf3   : > { %v471_v1 = vsel %vm455_vm1, %v1887_v61, 0.0  ;;  %v526_v6 = vmul.f32 %v1887_v61, %v1887_v61  ;;  %v549_v12 = vsel %vm455_vm1, %v525_v8, 0.0  ;;  %v1931_v25 = vadd.f32 %v1846_v35, %v1818_v14  ;;  %v1665_v14 = vld [vmem:[%s2433_s2] sm:$0xff]  }
  0xf4   : > { %v558_v5 = vsel %vm455_vm1, %v528_v2, 0.0  ;;  %v495_v24 = vsel %vm455_vm1, %v1917_v17, 0.0  ;;  %v492_v27 = vsel %vm455_vm1, %v1920_v18, 0.0  ;;  %v501_v28 = vsel %vm455_vm1, %v1925_v23, 0.0  ;;  %1595 = vmatprep.subr.bf16.mxu1 %v1665_v14 }
  0xf5   : > { %484 = vadd.xlane.f32.xlu1 %v483_v46  ;;  %v552_v9 = vsel %vm455_vm1, %v526_v6, 0.0  ;;  %v534_v30 = vmul.f32 %v1917_v17, %v1917_v17  ;;  %v498_v32 = vsel %vm455_vm1, %v1931_v25, 0.0  ;;  %v533_v33 = vmul.f32 %v1920_v18, %v1920_v18  ;;  %1596 = vmatpush3.bf16.msra.mxu1 %v1665_v14 }
  0xf6   : > { %544 = vadd.xlane.f32.xlu0 %v543_v48  ;;  %v536_v35 = vmul.f32 %v1925_v23, %v1925_v23  ;;  %v535_v37 = vmul.f32 %v1931_v25, %v1931_v25  ;;  %1597 = vmatprep.subr.bf16.mxu1 %v1666_v39 }
  0xf7   : > { %v576_v34 = vsel %vm455_vm1, %v534_v30, 0.0  ;;  %v573_v36 = vsel %vm455_vm1, %v533_v33, 0.0 }
  0xf8   : > { %v582_v40 = vsel %vm455_vm1, %v536_v35, 0.0  ;;  %v579_v41 = vsel %vm455_vm1, %v535_v37, 0.0 }
  0xf9   : > { %547 = vadd.xlane.f32.xlu1 %v546_v49  ;;  %1598 = vmatpush3.bf16.msra.mxu1 %v1666_v39 }
  0xfa   : > { %460 = vadd.xlane.f32.xlu0 %v459_v51  ;;  %1599 = vmatprep.subr.bf16.mxu1 %v1667_v42 }
  0xfd   : > { %541 = vadd.xlane.f32.xlu1 %v540_v53  ;;  %1600 = vmatpush3.bf16.msra.mxu1 %v1667_v42 }
  0xfe   : > { %538 = vadd.xlane.f32.xlu0 %v537_v55  ;;  %1601 = vmatprep.subr.bf16.mxu1 %v1668_v43 }
 0x101   : > { %565 = vadd.xlane.f32.xlu1 %v564_v58  ;;  %1602 = vmatpush3.bf16.msra.mxu1 %v1668_v43 }
 0x102   : > { %562 = vadd.xlane.f32.xlu0 %v561_v60 }
 0x105   : > { %478 = vadd.xlane.f32.xlu1 %v477_v62 }
 0x106   : > { %475 = vadd.xlane.f32.xlu0 %v474_v0 }
 0x109   : > { %472 = vadd.xlane.f32.xlu1 %v471_v1 }
 0x10a   : > { %469 = vadd.xlane.f32.xlu0 %v468_v3 }
 0x10d   : > { %559 = vadd.xlane.f32.xlu1 %v558_v5 }
 0x10e   : > { %556 = vadd.xlane.f32.xlu0 %v555_v7 }
 0x111   : > { %553 = vadd.xlane.f32.xlu1 %v552_v9 }
 0x112   : > { %550 = vadd.xlane.f32.xlu0 %v549_v12 }
 0x115   : > { %571 = vadd.xlane.f32.xlu1 %v570_v20 }
 0x116   : > { %568 = vadd.xlane.f32.xlu0 %v567_v21 }
 0x119   : > { %496 = vadd.xlane.f32.xlu1 %v495_v24 }
 0x11a   : > { %493 = vadd.xlane.f32.xlu0 %v492_v27 }
 0x11d   : > { %502 = vadd.xlane.f32.xlu1 %v501_v28 }
 0x11e   : > { %499 = vadd.xlane.f32.xlu0 %v498_v32 }
 0x121   : > { %577 = vadd.xlane.f32.xlu1 %v576_v34 }
 0x122   : > { %574 = vadd.xlane.f32.xlu0 %v573_v36 }
 0x125   : > { %583 = vadd.xlane.f32.xlu1 %v582_v40 }
 0x126   : > { %580 = vadd.xlane.f32.xlu0 %v579_v41 }
 0x176   : > { %v464_v44 = vpop.xlane.xlu1 %463 }
 0x177   : > { %v1963_v46 = vpop.xlane.xlu0 %487  ;;  %v1967_v51 = vmul.f32 0.015625, %v464_v44 }
 0x179   : > { %v603_v55 = vmul.f32 %v1967_v51, %v1967_v51 }
 0x17a   : > { %v467_v47 = vpop.xlane.xlu1 %466 }
 0x17b   : > { %v458_v48 = vpop.xlane.xlu0 %457  ;;  %v1969_v53 = vmul.f32 0.015625, %v467_v47 }
 0x17c   : > { %v1975_v2 = vmul.f32 0.015625, %v458_v48 }
 0x17d   : > { %v604_v62 = vmul.f32 %v1969_v53, %v1969_v53 }
 0x17e   : > { %v1965_v49 = vpop.xlane.xlu1 %490  ;;  %v601_v20 = vmul.f32 %v1975_v2, %v1975_v2 }
 0x17f   : > { %v482_v50 = vpop.xlane.xlu0 %481 }
 0x180   : > { %v1985_v21 = vmul.f32 0.015625, %v482_v50 }
 0x182   : > { %v485_v52 = vpop.xlane.xlu1 %484  ;;  %v609_v36 = vmul.f32 %v1985_v21, %v1985_v21 }
 0x183   : > { %v545_v54 = vpop.xlane.xlu0 %544  ;;  %v1979_v8 = vmul.f32 0.015625, %v485_v52  ;;  %v735_v52 = vsub.s32 2, %v1809_v11 }
 0x184   : > { %v587_v56 = vmul.f32 0.015625, %v545_v54  ;;  %v715_v54 = vsub.s32 1, %v1809_v11 }
 0x185   : > { %v610_v33 = vmul.f32 %v1979_v8, %v1979_v8 }
 0x186   : > { %v619_v58 = vsub.f32 %v587_v56, %v603_v55  ;;  %v548_v60 = vpop.xlane.xlu1 %547 }
 0x187   : > { %v588_v0 = vmul.f32 0.015625, %v548_v60  ;;  %v461_v1 = vpop.xlane.xlu0 %460  ;;  %v651_v60 = vsub.f32 %v1821_v16, %v1967_v51  ;;  %v2011_v16 = vmul.f32 0.015625, %v1965_v49 }
 0x188   : > { %v635_v3 = vmax.f32 %v619_v58, 0.0  ;;  %v1977_v4 = vmul.f32 0.015625, %v461_v1 }
 0x189   : > { %v620_v5 = vsub.f32 %v588_v0, %v604_v62 }
 0x18a   : > { %v667_v6 = vadd.f32 1e-05, %v635_v3  ;;  %v542_v7 = vpop.xlane.xlu1 %541  ;;  %v602_v10 = vmul.f32 %v1977_v4, %v1977_v4  ;;  %v652_v3 = vsub.f32 %v1827_v22, %v1969_v53 }
 0x18b   : > { %v636_v9 = vmax.f32 %v620_v5, 0.0  ;;  %v586_v12 = vmul.f32 0.015625, %v542_v7  ;;  %v539_v15 = vpop.xlane.xlu0 %538  ;;  %v2002_v7 = vrot.slane %v1815_v13, %v735_v52 }
 0x18c   : > { %1673 = vrsqrt.f32 %v667_v6  ;;  %v585_v24 = vmul.f32 0.015625, %v539_v15  ;;  %v650_v15 = vsub.f32 %v1858_v45, %v1977_v4  ;;  %v649_v4 = vsub.f32 %v1832_v26, %v1975_v2 }
 0x18d   : > { %v668_v27 = vadd.f32 1e-05, %v636_v9  ;;  %v618_v28 = vsub.f32 %v586_v12, %v602_v10  ;;  %v2005_v9 = vmul.f32 0.015625, %v1963_v46  ;;  %v2008_v10 = vrot.slane %v1815_v13, %v715_v54 }
 0x18e   : > { %v617_v30 = vsub.f32 %v585_v24, %v601_v20  ;;  %v566_v32 = vpop.xlane.xlu1 %565 }
 0x18f   : > { %1675 = vrsqrt.f32 %v668_v27  ;;  %v634_v14 = vmax.f32 %v618_v28, 0.0  ;;  %v594_v34 = vmul.f32 0.015625, %v566_v32  ;;  %v563_v35 = vpop.xlane.xlu0 %562  ;;  %v611_v45 = vmul.f32 %v2005_v9, %v2005_v9 }
 0x190   : > { %v633_v37 = vmax.f32 %v617_v30, 0.0  ;;  %v593_v39 = vmul.f32 0.015625, %v563_v35  ;;  %v612_v35 = vmul.f32 %v2011_v16, %v2011_v16 }
 0x191   : > { %v666_v40 = vadd.f32 1e-05, %v634_v14  ;;  %v626_v41 = vsub.f32 %v594_v34, %v610_v33 }
 0x192   : > { %v665_v42 = vadd.f32 1e-05, %v633_v37  ;;  %v625_v43 = vsub.f32 %v593_v39, %v609_v36  ;;  %v479_v44 = vpop.xlane.xlu1 %478 }
 0x193   : > { %1677 = vrsqrt.f32 %v666_v40  ;;  %v476_v47 = vpop.xlane.xlu0 %475  ;;  %v642_v48 = vmax.f32 %v626_v41, 0.0  ;;  %v1993_v56 = vmul.f32 0.015625, %v479_v44 }
 0x194   : > { %1679 = vrsqrt.f32 %v665_v42  ;;  %v641_v50 = vmax.f32 %v625_v43, 0.0  ;;  %v1997_v0 = vmul.f32 0.015625, %v476_v47 }
 0x195   : > { %v674_v5 = vadd.f32 1e-05, %v642_v48  ;;  %v608_v22 = vmul.f32 %v1993_v56, %v1993_v56 }
 0x196   : > { %v1674_v55 = vpop.eup %1673  ;;  %v473_v58 = vpop.xlane.xlu1 %472  ;;  %v673_v62 = vadd.f32 1e-05, %v641_v50  ;;  %v607_v46 = vmul.f32 %v1997_v0, %v1997_v0 }
 0x197   : > { %v470_v1 = vpop.xlane.xlu0 %469  ;;  %v699_v12 = vmul.f32 %v1674_v55, %v651_v60  ;;  %v2019_v20 = vmul.f32 0.015625, %v473_v58 }
 0x198   : > { %1681 = vrsqrt.f32 %v673_v62  ;;  %v2022_v49 = vmul.f32 0.015625, %v470_v1 }
 0x199   : > { %v1676_v6 = vpop.eup %1675  ;;  %1683 = vrsqrt.f32 %v674_v5  ;;  %v719_v33 = vmul.f32 %v2008_v10, %v699_v12  ;;  %v606_v41 = vmul.f32 %v2019_v20, %v2019_v20 }
 0x19a   : > { %v700_v51 = vmul.f32 %v1676_v6, %v652_v3  ;;  %v560_v53 = vpop.xlane.xlu1 %559  ;;  %v605_v26 = vmul.f32 %v2022_v49, %v2022_v49 }
 0x19b   : > { %v592_v24 = vmul.f32 0.015625, %v560_v53  ;;  %v557_v27 = vpop.xlane.xlu0 %556  ;;  %v739_v52 = vadd.f32 %v2002_v7, %v719_v33 }
 0x19c   : > { %v720_v28 = vmul.f32 %v2008_v10, %v700_v51  ;;  %v591_v30 = vmul.f32 0.015625, %v557_v27 }
 0x19d   : > { %v1678_v32 = vpop.eup %1677  ;;  %v624_v14 = vsub.f32 %v592_v24, %v608_v22 }
 0x19e   : > { %v1680_v34 = vpop.eup %1679  ;;  %v740_v36 = vadd.f32 %v2002_v7, %v720_v28  ;;  %v623_v37 = vsub.f32 %v591_v30, %v607_v46  ;;  %v554_v39 = vpop.xlane.xlu1 %553  ;;  %v698_v40 = vmul.f32 %v1678_v32, %v650_v15 }
 0x19f   : > { %v640_v42 = vmax.f32 %v624_v14, 0.0  ;;  %v590_v43 = vmul.f32 0.015625, %v554_v39  ;;  %v551_v44 = vpop.xlane.xlu0 %550  ;;  %v697_v47 = vmul.f32 %v1680_v34, %v649_v4  ;;  %v657_v4 = vsub.f32 %v1842_v31, %v1985_v21 }
 0x1a0   : > { %v639_v2 = vmax.f32 %v623_v37, 0.0  ;;  %v589_v48 = vmul.f32 0.015625, %v551_v44  ;;  %v718_v50 = vmul.f32 %v2008_v10, %v698_v40  ;;  %v756_v5 = vmax.f32 %v740_v36, 0.0 }
 0x1a1   : > { %v672_v54 = vadd.f32 1e-05, %v640_v42  ;;  %v622_v55 = vsub.f32 %v590_v43, %v606_v41  ;;  %v717_v58 = vmul.f32 %v2008_v10, %v697_v47  ;;  %v755_v36 = vmax.f32 %v739_v52, 0.0 }
 0x1a2   : > { %v671_v60 = vadd.f32 1e-05, %v639_v2  ;;  %v621_v62 = vsub.f32 %v589_v48, %v605_v26  ;;  %v572_v1 = vpop.xlane.xlu1 %571  ;;  %v738_v3 = vadd.f32 %v2002_v7, %v718_v50  ;;  %v1682_v24 = vpop.eup %1681  ;;  %v658_v37 = vsub.f32 %v1849_v38, %v1979_v8 }
 0x1a3   : > { %1685 = vrsqrt.f32 %v672_v54  ;;  %v638_v6 = vmax.f32 %v622_v55, 0.0  ;;  %v596_v12 = vmul.f32 0.015625, %v572_v1  ;;  %v569_v51 = vpop.xlane.xlu0 %568  ;;  %v737_v15 = vadd.f32 %v2002_v7, %v717_v58  ;;  %v1684_v32 = vpop.eup %1683 }
 0x1a4   : > { %1687 = vrsqrt.f32 %v671_v60  ;;  %v637_v22 = vmax.f32 %v621_v62, 0.0  ;;  %v595_v53 = vmul.f32 0.015625, %v569_v51  ;;  %v754_v46 = vmax.f32 %v738_v3, 0.0 }
 0x1a5   : > { %v670_v27 = vadd.f32 1e-05, %v638_v6  ;;  %v628_v28 = vsub.f32 %v596_v12, %v612_v35  ;;  %v753_v30 = vmax.f32 %v737_v15, 0.0  ;;  %v770_v43 = vpack.c.bf16 %v756_v5, %v755_v36 }
 0x1a6   : > { %v669_v33 = vadd.f32 1e-05, %v637_v22  ;;  %v627_v14 = vsub.f32 %v595_v53, %v611_v45  ;;  %v497_v34 = vpop.xlane.xlu1 %496  ;;  %v705_v35 = vmul.f32 %v1682_v24, %v657_v4  ;;  %v706_v47 = vmul.f32 %v1684_v32, %v658_v37 }
 0x1a7   : > { %1689 = vrsqrt.f32 %v670_v27  ;;  %v644_v39 = vmax.f32 %v628_v28, 0.0  ;;  %v494_v40 = vpop.xlane.xlu0 %493  ;;  %v769_v41 = vpack.c.bf16 %v754_v46, %v753_v30  ;;  %v2047_v45 = vmul.f32 0.015625, %v497_v34 }
 0x1a8   : > { %1691 = vrsqrt.f32 %v669_v33  ;;  %v643_v42 = vmax.f32 %v627_v14, 0.0  ;;  %v656_v8 = vsub.f32 %v1879_v57, %v1993_v56  ;;  %v2051_v26 = vmul.f32 0.015625, %v494_v40 }
 0x1a9   : > { %v676_v44 = vadd.f32 1e-05, %v644_v39  ;;  %1603 = vmatprep.mubr.msk.bf16.mxu1 %vm455_vm1, %v769_v41  ;;  %v725_v2 = vmul.f32 %v2008_v10, %v705_v35  ;;  %v659_v50 = vsub.f32 %v1824_v19, %v2005_v9  ;;  %v655_v52 = vsub.f32 %v1883_v59, %v1997_v0 }
 0x1aa   : > { %v675_v31 = vadd.f32 1e-05, %v643_v42  ;;  %1604 = vmatmul.mubr.msk.bf16.vlgmr.msra.gmra.mrb[8].mxu1 %vm455_vm1, %v770_v43  ;;  %v503_v21 = vpop.xlane.xlu1 %502  ;;  %v614_v54 = vmul.f32 %v2047_v45, %v2047_v45  ;;  %v726_v55 = vmul.f32 %v2008_v10, %v706_v47  ;;  %v660_v57 = vsub.f32 %v1837_v29, %v2011_v16 }
 0x1ab   : > { %1693 = vrsqrt.f32 %v676_v44  ;;  %v500_v38 = vpop.xlane.xlu0 %499  ;;  %v654_v56 = vsub.f32 %v1887_v61, %v2019_v20  ;;  %v613_v60 = vmul.f32 %v2051_v26, %v2051_v26  ;;  %v653_v59 = vsub.f32 %v1892_v63, %v2022_v49 }
 0x1ac   : > { %1695 = vrsqrt.f32 %v675_v31  ;;  %v2069_v0 = vmul.f32 0.015625, %v503_v21  ;;  %v2071_v5 = vmul.f32 0.015625, %v500_v38  ;;  %v745_v61 = vadd.f32 %v2002_v7, %v725_v2 }
 0x1ad   : > { %v1686_v48 = vpop.eup %1685  ;;  %v746_v63 = vadd.f32 %v2002_v7, %v726_v55 }
 0x1ae   : > { %v1688_v58 = vpop.eup %1687  ;;  %v578_v62 = vpop.xlane.xlu1 %577  ;;  %v704_v19 = vmul.f32 %v1686_v48, %v656_v8  ;;  %v616_v20 = vmul.f32 %v2069_v0, %v2069_v0  ;;  %v615_v15 = vmul.f32 %v2071_v5, %v2071_v5  ;;  %v761_v36 = vmax.f32 %v745_v61, 0.0 }
 0x1af   : > { %v598_v9 = vmul.f32 0.015625, %v578_v62  ;;  %v575_v1 = vpop.xlane.xlu0 %574  ;;  %v703_v3 = vmul.f32 %v1688_v58, %v655_v52  ;;  %v762_v58 = vmax.f32 %v746_v63, 0.0  ;;  %v661_v61 = vsub.f32 %v1920_v18, %v2051_v26 }
 0x1b0   : > { %v597_v6 = vmul.f32 0.015625, %v575_v1  ;;  %v724_v29 = vmul.f32 %v2008_v10, %v704_v19 }
 0x1b1   : > { %v1690_v16 = vpop.eup %1689  ;;  %v630_v12 = vsub.f32 %v598_v9, %v614_v54  ;;  %v723_v51 = vmul.f32 %v2008_v10, %v703_v3  ;;  %v773_v1 = vpack.c.bf16 %v762_v58, %v761_v36 }
 0x1b2   : > { %v1692_v49 = vpop.eup %1691  ;;  %v629_v22 = vsub.f32 %v597_v6, %v613_v60  ;;  %v584_v53 = vpop.xlane.xlu1 %583  ;;  %v702_v46 = vmul.f32 %v1690_v16, %v654_v56  ;;  %v744_v24 = vadd.f32 %v2002_v7, %v724_v29 }
 0x1b3   : > { %v646_v27 = vmax.f32 %v630_v12, 0.0  ;;  %v600_v28 = vmul.f32 0.015625, %v584_v53  ;;  %v581_v30 = vpop.xlane.xlu0 %580  ;;  %v701_v32 = vmul.f32 %v1692_v49, %v653_v59  ;;  %v743_v4 = vadd.f32 %v2002_v7, %v723_v51 }
 0x1b4   : > { %v645_v33 = vmax.f32 %v629_v22, 0.0  ;;  %v599_v14 = vmul.f32 0.015625, %v581_v30  ;;  %v722_v34 = vmul.f32 %v2008_v10, %v702_v46  ;;  %v760_v42 = vmax.f32 %v744_v24, 0.0 }
 0x1b5   : > { %v1694_v37 = vpop.eup %1693  ;;  %v678_v39 = vadd.f32 1e-05, %v646_v27  ;;  %v632_v40 = vsub.f32 %v600_v28, %v616_v20  ;;  %v721_v41 = vmul.f32 %v2008_v10, %v701_v32  ;;  %v759_v8 = vmax.f32 %v743_v4, 0.0 }
 0x1b6   : > { %v1696_v43 = vpop.eup %1695  ;;  %v677_v35 = vadd.f32 1e-05, %v645_v33  ;;  %v631_v44 = vsub.f32 %v599_v14, %v615_v15  ;;  %v742_v47 = vadd.f32 %v2002_v7, %v722_v34  ;;  %v708_v31 = vmul.f32 %v1694_v37, %v660_v57 }
 0x1b7   : > { %1697 = vrsqrt.f32 %v678_v39  ;;  %v648_v21 = vmax.f32 %v632_v40, 0.0  ;;  %v741_v38 = vadd.f32 %v2002_v7, %v721_v41  ;;  %v707_v52 = vmul.f32 %v1696_v43, %v659_v50 }
 0x1b8   : > { %1699 = vrsqrt.f32 %v677_v35  ;;  %v647_v2 = vmax.f32 %v631_v44, 0.0  ;;  %v758_v48 = vmax.f32 %v742_v47, 0.0  ;;  %v728_v56 = vmul.f32 %v2008_v10, %v708_v31 }
 0x1b9   : > { %v680_v54 = vadd.f32 1e-05, %v648_v21  ;;  %v757_v55 = vmax.f32 %v741_v38, 0.0  ;;  %v727_v62 = vmul.f32 %v2008_v10, %v707_v52  ;;  %v772_v57 = vpack.c.bf16 %v760_v42, %v759_v8 }
 0x1ba   : > { %v679_v60 = vadd.f32 1e-05, %v647_v2  ;;  %v748_v9 = vadd.f32 %v2002_v7, %v728_v56  ;;  %v662_v50 = vsub.f32 %v1917_v17, %v2047_v45  ;;  %v664_v51 = vsub.f32 %v1925_v23, %v2069_v0 }
 0x1bb   : > { %1701 = vrsqrt.f32 %v680_v54  ;;  %v771_v19 = vpack.c.bf16 %v758_v48, %v757_v55  ;;  %v747_v59 = vadd.f32 %v2002_v7, %v727_v62  ;;  %v663_v22 = vsub.f32 %v1931_v25, %v2071_v5 }
 0x1bc   : > { %1703 = vrsqrt.f32 %v679_v60  ;;  %v764_v6 = vmax.f32 %v748_v9, 0.0  ;;  %v787_v33 = vsub.s32 3, %v1809_v11 }
 0x1bd   : > { %1607 = vmatprep.mubr.msk.bf16.mxu1 %vm455_vm1, %v771_v19  ;;  %v763_v3 = vmax.f32 %v747_v59, 0.0 }
 0x1be   : > { %1608 = vmatmul.mubr.msk.bf16.gmra.mrb[12].mxu1 %vm455_vm1, %v772_v57  ;;  %v2115_v14 = vrot.slane %v1815_v13, %v787_v33 }
 0x1bf   : > { %1611 = vmatprep.mubr.msk.bf16.mxu1 %vm455_vm1, %v773_v1  ;;  %v774_v63 = vpack.c.bf16 %v764_v6, %v763_v3 }
 0x1c1   : > { %v1698_v29 = vpop.eup %1697 }
 0x1c2   : > { %v1700_v16 = vpop.eup %1699  ;;  %v710_v20 = vmul.f32 %v1698_v29, %v662_v50 }
 0x1c3   : > { %v709_v12 = vmul.f32 %v1700_v16, %v661_v61 }
 0x1c4   : > { %v730_v49 = vmul.f32 %v2008_v10, %v710_v20 }
 0x1c5   : > { %v1702_v15 = vpop.eup %1701  ;;  %v729_v17 = vmul.f32 %v2008_v10, %v709_v12 }
 0x1c6   : > { %v1704_v45 = vpop.eup %1703  ;;  %1612 = vmatmul.mubr.msk.bf16.gmra.mrb[16].mxu1 %vm455_vm1, %v774_v63  ;;  %v750_v18 = vadd.f32 %v2002_v7, %v730_v49  ;;  %v712_v26 = vmul.f32 %v1702_v15, %v664_v51 }
 0x1c7   : > { %v749_v53 = vadd.f32 %v2002_v7, %v729_v17  ;;  %v711_v46 = vmul.f32 %v1704_v45, %v663_v22 }
 0x1c8   : > { %v766_v24 = vmax.f32 %v750_v18, 0.0  ;;  %v732_v23 = vmul.f32 %v2008_v10, %v712_v26 }
 0x1c9   : > { %v765_v0 = vmax.f32 %v749_v53, 0.0  ;;  %v731_v27 = vmul.f32 %v2008_v10, %v711_v46 }
 0x1ca   : > { %v752_v28 = vadd.f32 %v2002_v7, %v732_v23 }
 0x1cb   : > { %v775_v25 = vpack.c.bf16 %v766_v24, %v765_v0  ;;  %v751_v5 = vadd.f32 %v2002_v7, %v731_v27 }
 0x1cc   : > { %v768_v30 = vmax.f32 %v752_v28, 0.0 }
 0x1cd   : > { %1615 = vmatprep.mubr.msk.bf16.mxu1 %vm455_vm1, %v775_v25  ;;  %v767_v32 = vmax.f32 %v751_v5, 0.0 }
 0x1cf   : > { %v776_v4 = vpack.c.bf16 %v768_v30, %v767_v32 }
 0x1d1   : > { %1616 = vmatmul.mubr.msk.bf16.gmra.mrb[20].mxu1 %vm455_vm1, %v776_v4  ;;  %v1669_v4 = vld [vmem:[%s2435_s4] sm:$0xff]  }
 0x1d2   : > { %1619 = vmatprep.subr.bf16.mxu0 %v1669_v4 }
 0x1d3   : > { %1620 = vmatpush3.bf16.msra.mxu0 %v1669_v4 }
 0x27d   : > { %v1605_v34 = vpop.f32.mrb[8].mxu1 }
 0x27e   : > { %v2118_v10 = vadd.f32 %v1605_v34, %v2115_v14  ;;  %v871_v36 = vpop.f32.mrb[9].mxu1 }
 0x27f   : > { %v1606_v37 = vpop.f32.mrb[10].mxu1  ;;  %v2121_v7 = vadd.f32 %v871_v36, %v2115_v14 }
 0x280   : > { %v2124_v39 = vadd.f32 %v1606_v37, %v2115_v14  ;;  %v874_v40 = vpop.f32.mrb[11].mxu1  ;;  %v940_v41 = vsel %vm455_vm1, %v2118_v10, 0.0  ;;  %v1000_v35 = vmul.f32 %v2118_v10, %v2118_v10 }
 0x281   : > { %941 = vadd.xlane.f32.xlu0 %v940_v41  ;;  %v2129_v13 = vadd.f32 %v874_v40, %v2115_v14  ;;  %v934_v43 = vsel %vm455_vm1, %v2121_v7, 0.0  ;;  %v998_v21 = vmul.f32 %v2121_v7, %v2121_v7  ;;  %v1670_v40 = vld [vmem:[%s2435_s4 + $0x8] sm:$0xff]  }
 0x282   : > { %v943_v42 = vsel %vm455_vm1, %v2124_v39, 0.0  ;;  %v1001_v47 = vmul.f32 %v2124_v39, %v2124_v39  ;;  %v1020_v31 = vsel %vm455_vm1, %v1000_v35, 0.0  ;;  %1621 = vmatprep.subr.bf16.mxu0 %v1670_v40 }
 0x283   : > { %944 = vadd.xlane.f32.xlu1 %v943_v42  ;;  %v937_v44 = vsel %vm455_vm1, %v2129_v13, 0.0  ;;  %v999_v8 = vmul.f32 %v2129_v13, %v2129_v13  ;;  %v1014_v2 = vsel %vm455_vm1, %v998_v21, 0.0  ;;  %1622 = vmatpush3.bf16.msra.mxu0 %v1670_v40 }
 0x284   : > { %v1023_v38 = vsel %vm455_vm1, %v1001_v47, 0.0 }
 0x285   : > { %935 = vadd.xlane.f32.xlu0 %v934_v43  ;;  %v1017_v48 = vsel %vm455_vm1, %v999_v8, 0.0  ;;  %v1672_v8 = vld [vmem:[%s2435_s4 + $0x18] sm:$0xff]  }
 0x287   : > { %938 = vadd.xlane.f32.xlu1 %v937_v44  ;;  %v1671_v44 = vld [vmem:[%s2435_s4 + $0x10] sm:$0xff]  }
 0x288   : > { %1623 = vmatprep.subr.bf16.mxu0 %v1671_v44 }
 0x289   : > { %1021 = vadd.xlane.f32.xlu0 %v1020_v31  ;;  %1624 = vmatpush3.bf16.msra.mxu0 %v1671_v44  ;;  %v1192_v44 = vsub.s32 4, %v1809_v11 }
 0x28a   : > { %1625 = vmatprep.subr.bf16.mxu0 %v1672_v8 }
 0x28b   : > { %1024 = vadd.xlane.f32.xlu1 %v1023_v38 }
 0x28d   : > { %1015 = vadd.xlane.f32.xlu0 %v1014_v2  ;;  %1626 = vmatpush3.bf16.msra.mxu0 %v1672_v8 }
 0x28f   : > { %1018 = vadd.xlane.f32.xlu1 %v1017_v48 }
 0x291   : > { %v1609_v52 = vpop.f32.mrb[12].mxu1 }
 0x292   : > { %v2150_v54 = vadd.f32 %v1609_v52, %v2115_v14  ;;  %v887_v55 = vpop.f32.mrb[13].mxu1 }
 0x293   : > { %v1610_v58 = vpop.f32.mrb[14].mxu1  ;;  %v2153_v56 = vadd.f32 %v887_v55, %v2115_v14 }
 0x294   : > { %v2156_v60 = vadd.f32 %v1610_v58, %v2115_v14  ;;  %v890_v62 = vpop.f32.mrb[15].mxu1  ;;  %v952_v19 = vsel %vm455_vm1, %v2150_v54, 0.0  ;;  %v1004_v1 = vmul.f32 %v2150_v54, %v2150_v54 }
 0x295   : > { %953 = vadd.xlane.f32.xlu0 %v952_v19  ;;  %v2161_v57 = vadd.f32 %v890_v62, %v2115_v14  ;;  %v946_v9 = vsel %vm455_vm1, %v2153_v56, 0.0  ;;  %v1002_v12 = vmul.f32 %v2153_v56, %v2153_v56 }
 0x296   : > { %v955_v59 = vsel %vm455_vm1, %v2156_v60, 0.0  ;;  %v1005_v29 = vmul.f32 %v2156_v60, %v2156_v60  ;;  %v1032_v20 = vsel %vm455_vm1, %v1004_v1, 0.0 }
 0x297   : > { %956 = vadd.xlane.f32.xlu1 %v955_v59  ;;  %v949_v6 = vsel %vm455_vm1, %v2161_v57, 0.0  ;;  %v1003_v63 = vmul.f32 %v2161_v57, %v2161_v57  ;;  %v1026_v15 = vsel %vm455_vm1, %v1002_v12, 0.0 }
 0x298   : > { %v1035_v51 = vsel %vm455_vm1, %v1005_v29, 0.0 }
 0x299   : > { %947 = vadd.xlane.f32.xlu0 %v946_v9  ;;  %v1613_v50 = vpop.f32.mrb[16].mxu1  ;;  %v1029_v17 = vsel %vm455_vm1, %v1003_v63, 0.0 }
 0x29a   : > { %v903_v3 = vpop.f32.mrb[17].mxu1  ;;  %v2180_v49 = vadd.f32 %v1613_v50, %v2115_v14 }
 0x29b   : > { %950 = vadd.xlane.f32.xlu1 %v949_v6  ;;  %v1614_v61 = vpop.f32.mrb[18].mxu1  ;;  %v2188_v45 = vadd.f32 %v903_v3, %v2115_v14 }
 0x29c   : > { %v906_v16 = vpop.f32.mrb[19].mxu1  ;;  %v2184_v22 = vadd.f32 %v1614_v61, %v2115_v14  ;;  %v964_v26 = vsel %vm455_vm1, %v2180_v49, 0.0  ;;  %v1008_v28 = vmul.f32 %v2180_v49, %v2180_v49 }
 0x29d   : > { %1033 = vadd.xlane.f32.xlu0 %v1032_v20  ;;  %v2193_v46 = vadd.f32 %v906_v16, %v2115_v14  ;;  %v958_v27 = vsel %vm455_vm1, %v2188_v45, 0.0  ;;  %v1006_v32 = vmul.f32 %v2188_v45, %v2188_v45 }
 0x29e   : > { %v967_v23 = vsel %vm455_vm1, %v2184_v22, 0.0  ;;  %v1009_v5 = vmul.f32 %v2184_v22, %v2184_v22  ;;  %v1044_v30 = vsel %vm455_vm1, %v1008_v28, 0.0 }
 0x29f   : > { %1036 = vadd.xlane.f32.xlu1 %v1035_v51  ;;  %v961_v25 = vsel %vm455_vm1, %v2193_v46, 0.0  ;;  %v1007_v34 = vmul.f32 %v2193_v46, %v2193_v46  ;;  %v1038_v37 = vsel %vm455_vm1, %v1006_v32, 0.0 }
 0x2a0   : > { %v1047_v33 = vsel %vm455_vm1, %v1009_v5, 0.0 }
 0x2a1   : > { %1027 = vadd.xlane.f32.xlu0 %v1026_v15  ;;  %v1041_v42 = vsel %vm455_vm1, %v1007_v34, 0.0 }
 0x2a3   : > { %1030 = vadd.xlane.f32.xlu1 %v1029_v17 }
 0x2a4   : > { %v1617_v18 = vpop.f32.mrb[20].mxu1 }
 0x2a5   : > { %965 = vadd.xlane.f32.xlu0 %v964_v26  ;;  %v919_v53 = vpop.f32.mrb[21].mxu1  ;;  %v2215_v36 = vadd.f32 %v1617_v18, %v2115_v14 }
 0x2a6   : > { %v1618_v24 = vpop.f32.mrb[22].mxu1  ;;  %v2226_v43 = vadd.f32 %v919_v53, %v2115_v14 }
 0x2a7   : > { %968 = vadd.xlane.f32.xlu1 %v967_v23  ;;  %v922_v0 = vpop.f32.mrb[23].mxu1  ;;  %v2222_v41 = vadd.f32 %v1618_v24, %v2115_v14  ;;  %v976_v35 = vsel %vm455_vm1, %v2215_v36, 0.0  ;;  %v1012_v52 = vmul.f32 %v2215_v36, %v2215_v36 }
 0x2a8   : > { %v2234_v47 = vadd.f32 %v922_v0, %v2115_v14  ;;  %v970_v21 = vsel %vm455_vm1, %v2226_v43, 0.0  ;;  %v1010_v38 = vmul.f32 %v2226_v43, %v2226_v43 }
 0x2a9   : > { %959 = vadd.xlane.f32.xlu0 %v958_v27  ;;  %v979_v31 = vsel %vm455_vm1, %v2222_v41, 0.0  ;;  %v1013_v58 = vmul.f32 %v2222_v41, %v2222_v41  ;;  %v1056_v62 = vsel %vm455_vm1, %v1012_v52, 0.0 }
 0x2aa   : > { %v973_v14 = vsel %vm455_vm1, %v2234_v47, 0.0  ;;  %v1011_v2 = vmul.f32 %v2234_v47, %v2234_v47  ;;  %v1050_v48 = vsel %vm455_vm1, %v1010_v38, 0.0 }
 0x2ab   : > { %962 = vadd.xlane.f32.xlu1 %v961_v25  ;;  %v1059_v19 = vsel %vm455_vm1, %v1013_v58, 0.0 }
 0x2ac   : > { %v1053_v55 = vsel %vm455_vm1, %v1011_v2, 0.0  ;;  %v1212_v2 = vsub.s32 5, %v1809_v11 }
 0x2ad   : > { %1045 = vadd.xlane.f32.xlu0 %v1044_v30 }
 0x2af   : > { %1048 = vadd.xlane.f32.xlu1 %v1047_v33 }
 0x2b1   : > { %1039 = vadd.xlane.f32.xlu0 %v1038_v37 }
 0x2b3   : > { %1042 = vadd.xlane.f32.xlu1 %v1041_v42 }
 0x2b5   : > { %977 = vadd.xlane.f32.xlu0 %v976_v35 }
 0x2b7   : > { %980 = vadd.xlane.f32.xlu1 %v979_v31 }
 0x2b9   : > { %971 = vadd.xlane.f32.xlu0 %v970_v21 }
 0x2bb   : > { %974 = vadd.xlane.f32.xlu1 %v973_v14 }
 0x2bd   : > { %1051 = vadd.xlane.f32.xlu0 %v1050_v48 }
 0x2bf   : > { %1054 = vadd.xlane.f32.xlu1 %v1053_v55  ;;  %v1737_v55 = vld [vmem:[%s2434_s3] sm:$0x3f] }
 0x2c0   : > { %v2272_v58 = vrot.slane %v1737_v55, %v1192_v44 }
 0x2c1   : > { %1057 = vadd.xlane.f32.xlu0 %v1056_v62 }
 0x2c3   : > { %1060 = vadd.xlane.f32.xlu1 %v1059_v19 }
 0x30e   : > { %v942_v59 = vpop.xlane.xlu0 %941 }
 0x30f   : > { %v984_v50 = vmul.f32 0.015625, %v942_v59 }
 0x310   : > { %v945_v9 = vpop.xlane.xlu1 %944 }
 0x311   : > { %v985_v6 = vmul.f32 0.015625, %v945_v9  ;;  %v1080_v61 = vmul.f32 %v984_v50, %v984_v50  ;;  %v1128_v38 = vsub.f32 %v2118_v10, %v984_v50 }
 0x312   : > { %v936_v1 = vpop.xlane.xlu0 %935 }
 0x313   : > { %v982_v16 = vmul.f32 0.015625, %v936_v1  ;;  %v1081_v63 = vmul.f32 %v985_v6, %v985_v6  ;;  %v1129_v52 = vsub.f32 %v2124_v39, %v985_v6 }
 0x314   : > { %v939_v3 = vpop.xlane.xlu1 %938 }
 0x315   : > { %v2257_v12 = vmul.f32 0.015625, %v939_v3  ;;  %v1078_v26 = vmul.f32 %v982_v16, %v982_v16  ;;  %v1126_v11 = vsub.f32 %v2121_v7, %v982_v16 }
 0x316   : > { %v1022_v29 = vpop.xlane.xlu0 %1021 }
 0x317   : > { %v1064_v20 = vmul.f32 0.015625, %v1022_v29  ;;  %v1079_v0 = vmul.f32 %v2257_v12, %v2257_v12  ;;  %v2281_v29 = vrot.slane %v1737_v55, %v1212_v2 }
 0x318   : > { %v1025_v51 = vpop.xlane.xlu1 %1024 }
 0x319   : > { %v1096_v15 = vsub.f32 %v1064_v20, %v1080_v61  ;;  %v1065_v17 = vmul.f32 0.015625, %v1025_v51 }
 0x31a   : > { %v1016_v18 = vpop.xlane.xlu0 %1015 }
 0x31b   : > { %v1112_v53 = vmax.f32 %v1096_v15, 0.0  ;;  %v1097_v24 = vsub.f32 %v1065_v17, %v1081_v63  ;;  %v1062_v23 = vmul.f32 0.015625, %v1016_v18  ;;  %v1127_v63 = vsub.f32 %v2129_v13, %v2257_v12 }
 0x31c   : > { %v1019_v27 = vpop.xlane.xlu1 %1018 }
 0x31d   : > { %v1144_v28 = vadd.f32 1e-05, %v1112_v53  ;;  %v1113_v25 = vmax.f32 %v1097_v24, 0.0  ;;  %v1094_v5 = vsub.f32 %v1062_v23, %v1078_v26  ;;  %v1063_v30 = vmul.f32 0.015625, %v1019_v27 }
 0x31f   : > { %1705 = vrsqrt.f32 %v1144_v28  ;;  %v1145_v32 = vadd.f32 1e-05, %v1113_v25  ;;  %v1110_v4 = vmax.f32 %v1094_v5, 0.0  ;;  %v1095_v33 = vsub.f32 %v1063_v30, %v1079_v0 }
 0x321   : > { %1707 = vrsqrt.f32 %v1145_v32  ;;  %v1142_v34 = vadd.f32 1e-05, %v1110_v4  ;;  %v1111_v37 = vmax.f32 %v1095_v33, 0.0 }
 0x322   : > { %v954_v40 = vpop.xlane.xlu0 %953 }
 0x323   : > { %1709 = vrsqrt.f32 %v1142_v34  ;;  %v1143_v42 = vadd.f32 1e-05, %v1111_v37  ;;  %v2262_v21 = vmul.f32 0.015625, %v954_v40 }
 0x324   : > { %v957_v35 = vpop.xlane.xlu1 %956 }
 0x325   : > { %1711 = vrsqrt.f32 %v1143_v42  ;;  %v2266_v48 = vmul.f32 0.015625, %v957_v35  ;;  %v1084_v10 = vmul.f32 %v2262_v21, %v2262_v21 }
 0x326   : > { %v948_v31 = vpop.xlane.xlu0 %947 }
 0x327   : > { %v2276_v9 = vmul.f32 0.015625, %v948_v31  ;;  %v1085_v61 = vmul.f32 %v2266_v48, %v2266_v48 }
 0x328   : > { %v951_v8 = vpop.xlane.xlu1 %950 }
 0x329   : > { %v1706_v14 = vpop.eup %1705  ;;  %v2279_v3 = vmul.f32 0.015625, %v951_v8  ;;  %v1082_v26 = vmul.f32 %v2276_v9, %v2276_v9 }
 0x32a   : > { %v1176_v62 = vmul.f32 %v1706_v14, %v1128_v38  ;;  %v1034_v19 = vpop.xlane.xlu0 %1033 }
 0x32b   : > { %v1708_v59 = vpop.eup %1707  ;;  %v1068_v1 = vmul.f32 0.015625, %v1034_v19  ;;  %v1083_v27 = vmul.f32 %v2279_v3, %v2279_v3 }
 0x32c   : > { %v1177_v50 = vmul.f32 %v1708_v59, %v1129_v52  ;;  %v1037_v39 = vpop.xlane.xlu1 %1036  ;;  %v1196_v15 = vmul.f32 %v2272_v58, %v1176_v62 }
 0x32d   : > { %v1710_v6 = vpop.eup %1709  ;;  %v1100_v20 = vsub.f32 %v1068_v1, %v1084_v10  ;;  %v1069_v51 = vmul.f32 0.015625, %v1037_v39 }
 0x32e   : > { %v1197_v17 = vmul.f32 %v2272_v58, %v1177_v50  ;;  %v1028_v7 = vpop.xlane.xlu0 %1027  ;;  %v1174_v16 = vmul.f32 %v1710_v6, %v1126_v11  ;;  %v1216_v4 = vadd.f32 %v2281_v29, %v1196_v15 }
 0x32f   : > { %v1712_v18 = vpop.eup %1711  ;;  %v1116_v53 = vmax.f32 %v1100_v20, 0.0  ;;  %v1101_v24 = vsub.f32 %v1069_v51, %v1085_v61  ;;  %v1066_v23 = vmul.f32 0.015625, %v1028_v7  ;;  %v1132_v51 = vsub.f32 %v2150_v54, %v2262_v21 }
 0x330   : > { %v1217_v0 = vadd.f32 %v2281_v29, %v1197_v17  ;;  %v1031_v28 = vpop.xlane.xlu1 %1030  ;;  %v1175_v13 = vmul.f32 %v1712_v18, %v1127_v63  ;;  %v1194_v12 = vmul.f32 %v2272_v58, %v1174_v16  ;;  %v1232_v59 = vmax.f32 %v1216_v4, 0.0 }
 0x331   : > { %v1148_v25 = vadd.f32 1e-05, %v1116_v53  ;;  %v1117_v5 = vmax.f32 %v1101_v24, 0.0  ;;  %v1098_v30 = vsub.f32 %v1066_v23, %v1082_v26  ;;  %v1067_v32 = vmul.f32 0.015625, %v1031_v28 }
 0x332   : > { %v966_v33 = vpop.xlane.xlu0 %965  ;;  %v1195_v34 = vmul.f32 %v2272_v58, %v1175_v13  ;;  %v1214_v37 = vadd.f32 %v2281_v29, %v1194_v12  ;;  %v1233_v14 = vmax.f32 %v1217_v0, 0.0  ;;  %v1133_v26 = vsub.f32 %v2156_v60, %v2266_v48 }
 0x333   : > { %1713 = vrsqrt.f32 %v1148_v25  ;;  %v1149_v40 = vadd.f32 1e-05, %v1117_v5  ;;  %v1114_v42 = vmax.f32 %v1098_v30, 0.0  ;;  %v1099_v35 = vsub.f32 %v1067_v32, %v1083_v27 }
 0x334   : > { %v969_v44 = vpop.xlane.xlu1 %968  ;;  %v1215_v31 = vadd.f32 %v2281_v29, %v1195_v34  ;;  %v1230_v52 = vmax.f32 %v1214_v37, 0.0  ;;  %v2299_v19 = vmul.f32 0.015625, %v966_v33  ;;  %v1247_v50 = vpack.c.bf16 %v1233_v14, %v1232_v59 }
 0x335   : > { %1715 = vrsqrt.f32 %v1149_v40  ;;  %v1146_v38 = vadd.f32 1e-05, %v1114_v42  ;;  %v1115_v8 = vmax.f32 %v1099_v35, 0.0  ;;  %v2301_v11 = vmul.f32 0.015625, %v969_v44 }
 0x336   : > { %v960_v2 = vpop.xlane.xlu0 %959  ;;  %v1231_v55 = vmax.f32 %v1215_v31, 0.0  ;;  %v1088_v6 = vmul.f32 %v2299_v19, %v2299_v19  ;;  %v1130_v28 = vsub.f32 %v2153_v56, %v2276_v9  ;;  %v1131_v4 = vsub.f32 %v2161_v57, %v2279_v3 }
 0x337   : > { %1717 = vrsqrt.f32 %v1146_v38  ;;  %v1147_v62 = vadd.f32 1e-05, %v1115_v8  ;;  %v2306_v61 = vmul.f32 0.015625, %v960_v2  ;;  %v1089_v7 = vmul.f32 %v2301_v11, %v2301_v11 }
 0x338   : > { %v963_v10 = vpop.xlane.xlu1 %962  ;;  %v1246_v1 = vpack.c.bf16 %v1231_v55, %v1230_v52 }
 0x339   : > { %1719 = vrsqrt.f32 %v1147_v62  ;;  %v2311_v63 = vmul.f32 0.015625, %v963_v10  ;;  %v1086_v0 = vmul.f32 %v2306_v61, %v2306_v61 }
 0x33a   : > { %1627 = vmatprep.mubr.msk.bf16.mxu0 %vm455_vm1, %v1246_v1  ;;  %v1046_v39 = vpop.xlane.xlu0 %1045 }
 0x33b   : > { %v1072_v20 = vmul.f32 0.015625, %v1046_v39  ;;  %1628 = vmatmul.mubr.msk.bf16.vlgmr.msra.gmra.mrb[8].mxu0 %vm455_vm1, %v1247_v50  ;;  %v1087_v13 = vmul.f32 %v2311_v63, %v2311_v63 }
 0x33c   : > { %v1049_v15 = vpop.xlane.xlu1 %1048 }
 0x33d   : > { %v1714_v17 = vpop.eup %1713  ;;  %v1104_v16 = vsub.f32 %v1072_v20, %v1088_v6  ;;  %v1073_v18 = vmul.f32 0.015625, %v1049_v15 }
 0x33e   : > { %v1040_v53 = vpop.xlane.xlu0 %1039  ;;  %v1180_v24 = vmul.f32 %v1714_v17, %v1132_v51 }
 0x33f   : > { %v1716_v23 = vpop.eup %1715  ;;  %v1120_v27 = vmax.f32 %v1104_v16, 0.0  ;;  %v1105_v54 = vsub.f32 %v1073_v18, %v1089_v7  ;;  %v1070_v21 = vmul.f32 0.015625, %v1040_v53  ;;  %v1136_v18 = vsub.f32 %v2180_v49, %v2299_v19 }
 0x340   : > { %v1043_v12 = vpop.xlane.xlu1 %1042  ;;  %v1181_v25 = vmul.f32 %v1716_v23, %v1133_v26  ;;  %v1200_v37 = vmul.f32 %v2272_v58, %v1180_v24 }
 0x341   : > { %v1718_v5 = vpop.eup %1717  ;;  %v1152_v30 = vadd.f32 1e-05, %v1120_v27  ;;  %v1121_v60 = vmax.f32 %v1105_v54, 0.0  ;;  %v1102_v48 = vsub.f32 %v1070_v21, %v1086_v0  ;;  %v1071_v32 = vmul.f32 0.015625, %v1043_v12 }
 0x342   : > { %v978_v33 = vpop.xlane.xlu0 %977  ;;  %v1178_v34 = vmul.f32 %v1718_v5, %v1130_v28  ;;  %v1201_v40 = vmul.f32 %v2272_v58, %v1181_v25  ;;  %v1220_v62 = vadd.f32 %v2281_v29, %v1200_v37  ;;  %v1137_v28 = vsub.f32 %v2184_v22, %v2301_v11 }
 0x343   : > { %v1720_v56 = vpop.eup %1719  ;;  %1721 = vrsqrt.f32 %v1152_v30  ;;  %v1153_v9 = vadd.f32 1e-05, %v1121_v60  ;;  %v1118_v42 = vmax.f32 %v1102_v48, 0.0  ;;  %v1103_v35 = vsub.f32 %v1071_v32, %v1087_v13 }
 0x344   : > { %v981_v44 = vpop.xlane.xlu1 %980  ;;  %v1179_v31 = vmul.f32 %v1720_v56, %v1131_v4  ;;  %v1198_v38 = vmul.f32 %v2272_v58, %v1178_v34  ;;  %v1221_v57 = vadd.f32 %v2281_v29, %v1201_v40  ;;  %v2337_v15 = vmul.f32 0.015625, %v978_v33 }
 0x345   : > { %1723 = vrsqrt.f32 %v1153_v9  ;;  %v1150_v8 = vadd.f32 1e-05, %v1118_v42  ;;  %v1119_v14 = vmax.f32 %v1103_v35, 0.0  ;;  %v1236_v16 = vmax.f32 %v1220_v62, 0.0 }
 0x346   : > { %v972_v3 = vpop.xlane.xlu0 %971  ;;  %v1199_v2 = vmul.f32 %v2272_v58, %v1179_v31  ;;  %v1218_v52 = vadd.f32 %v2281_v29, %v1198_v38  ;;  %v1237_v39 = vmax.f32 %v1221_v57, 0.0  ;;  %v2343_v26 = vmul.f32 0.015625, %v981_v44 }
 0x347   : > { %1725 = vrsqrt.f32 %v1150_v8  ;;  %v1151_v55 = vadd.f32 1e-05, %v1119_v14  ;;  %v2332_v59 = vmul.f32 0.015625, %v972_v3  ;;  %v1092_v49 = vmul.f32 %v2337_v15, %v2337_v15 }
 0x348   : > { %v975_v10 = vpop.xlane.xlu1 %974  ;;  %v1219_v1 = vadd.f32 %v2281_v29, %v1199_v2  ;;  %v1234_v20 = vmax.f32 %v1218_v52, 0.0  ;;  %v1249_v21 = vpack.c.bf16 %v1237_v39, %v1236_v16  ;;  %v1134_v60 = vsub.f32 %v2188_v45, %v2306_v61 }
 0x349   : > { %1727 = vrsqrt.f32 %v1151_v55  ;;  %v2335_v50 = vmul.f32 0.015625, %v975_v10  ;;  %v1090_v17 = vmul.f32 %v2332_v59, %v2332_v59  ;;  %v1093_v48 = vmul.f32 %v2343_v26, %v2343_v26 }
 0x34a   : > { %v1052_v6 = vpop.xlane.xlu0 %1051  ;;  %v1235_v51 = vmax.f32 %v1219_v1, 0.0  ;;  %v1135_v40 = vsub.f32 %v2193_v46, %v2311_v63  ;;  %v1138_v39 = vsub.f32 %v2226_v43, %v2332_v59  ;;  %v1141_v43 = vsub.f32 %v2222_v41, %v2343_v26 }
 0x34b   : > { %v1074_v7 = vmul.f32 0.015625, %v1052_v6  ;;  %v1091_v0 = vmul.f32 %v2335_v50, %v2335_v50 }
 0x34c   : > { %v1055_v53 = vpop.xlane.xlu1 %1054  ;;  %v1248_v24 = vpack.c.bf16 %v1235_v51, %v1234_v20 }
 0x34d   : > { %v1722_v23 = vpop.eup %1721  ;;  %v1106_v27 = vsub.f32 %v1074_v7, %v1090_v17  ;;  %v1075_v54 = vmul.f32 0.015625, %v1055_v53  ;;  %v1139_v17 = vsub.f32 %v2234_v47, %v2335_v50 }
 0x34e   : > { %1631 = vmatprep.mubr.msk.bf16.mxu0 %vm455_vm1, %v1248_v24  ;;  %v1058_v13 = vpop.xlane.xlu0 %1057  ;;  %v1184_v12 = vmul.f32 %v1722_v23, %v1136_v18  ;;  %v1140_v18 = vsub.f32 %v2215_v36, %v2337_v15 }
 0x34f   : > { %v1724_v25 = vpop.eup %1723  ;;  %v1122_v19 = vmax.f32 %v1106_v27, 0.0  ;;  %v1107_v5 = vsub.f32 %v1075_v54, %v1091_v0  ;;  %v1076_v30 = vmul.f32 0.015625, %v1058_v13  ;;  %1632 = vmatmul.mubr.msk.bf16.gmra.mrb[12].mxu0 %vm455_vm1, %v1249_v21 }
 0x350   : > { %v1061_v22 = vpop.xlane.xlu1 %1060  ;;  %v1185_v11 = vmul.f32 %v1724_v25, %v1137_v28  ;;  %v1204_v9 = vmul.f32 %v2272_v58, %v1184_v12 }
 0x351   : > { %v1726_v32 = vpop.eup %1725  ;;  %v1154_v4 = vadd.f32 1e-05, %v1122_v19  ;;  %v1123_v33 = vmax.f32 %v1107_v5, 0.0  ;;  %v1108_v34 = vsub.f32 %v1076_v30, %v1092_v49  ;;  %v1077_v37 = vmul.f32 0.015625, %v1061_v22  ;;  %v1526_v19 = vld [vmem:[%s2436_s5] ss:$0 sm:$0xff] }
 0x352   : > { %v1182_v56 = vmul.f32 %v1726_v32, %v1134_v60  ;;  %v1205_v42 = vmul.f32 %v2272_v58, %v1185_v11  ;;  %v1224_v2 = vadd.f32 %v2281_v29, %v1204_v9 }
 0x353   : > { %v1728_v35 = vpop.eup %1727  ;;  %1729 = vrsqrt.f32 %v1154_v4  ;;  %v1155_v45 = vadd.f32 1e-05, %v1123_v33  ;;  %v1124_v61 = vmax.f32 %v1108_v34, 0.0  ;;  %v1109_v44 = vsub.f32 %v1077_v37, %v1093_v48 }
 0x354   : > { %v1183_v31 = vmul.f32 %v1728_v35, %v1135_v40  ;;  %v1202_v38 = vmul.f32 %v2272_v58, %v1182_v56  ;;  %v1225_v57 = vadd.f32 %v2281_v29, %v1205_v42  ;;  %v1240_v1 = vmax.f32 %v1224_v2, 0.0 }
 0x355   : > { %1731 = vrsqrt.f32 %v1155_v45  ;;  %v1156_v8 = vadd.f32 1e-05, %v1124_v61  ;;  %v1125_v14 = vmax.f32 %v1109_v44, 0.0 }
 0x356   : > { %v1203_v46 = vmul.f32 %v2272_v58, %v1183_v31  ;;  %v1222_v63 = vadd.f32 %v2281_v29, %v1202_v38  ;;  %v1241_v55 = vmax.f32 %v1225_v57, 0.0 }
 0x357   : > { %1733 = vrsqrt.f32 %v1156_v8  ;;  %v1157_v3 = vadd.f32 1e-05, %v1125_v14 }
 0x358   : > { %v1223_v52 = vadd.f32 %v2281_v29, %v1203_v46  ;;  %v1238_v62 = vmax.f32 %v1222_v63, 0.0  ;;  %v1251_v51 = vpack.c.bf16 %v1241_v55, %v1240_v1 }
 0x359   : > { %1735 = vrsqrt.f32 %v1157_v3 }
 0x35a   : > { %v1239_v10 = vmax.f32 %v1223_v52, 0.0 }
 0x35c   : > { %v1250_v6 = vpack.c.bf16 %v1239_v10, %v1238_v62 }
 0x35d   : > { %v1730_v20 = vpop.eup %1729 }
 0x35e   : > { %1635 = vmatprep.mubr.msk.bf16.mxu0 %vm455_vm1, %v1250_v6  ;;  %v1186_v7 = vmul.f32 %v1730_v20, %v1138_v39 }
 0x35f   : > { %v1732_v16 = vpop.eup %1731  ;;  %1636 = vmatmul.mubr.msk.bf16.gmra.mrb[16].mxu0 %vm455_vm1, %v1251_v51 }
 0x360   : > { %v1187_v53 = vmul.f32 %v1732_v16, %v1139_v17  ;;  %v1206_v24 = vmul.f32 %v2272_v58, %v1186_v7 }
 0x361   : > { %v1734_v23 = vpop.eup %1733 }
 0x362   : > { %v1207_v59 = vmul.f32 %v2272_v58, %v1187_v53  ;;  %v1226_v47 = vadd.f32 %v2281_v29, %v1206_v24  ;;  %v1188_v50 = vmul.f32 %v1734_v23, %v1140_v18 }
 0x363   : > { %v1736_v0 = vpop.eup %1735 }
 0x364   : > { %v1227_v27 = vadd.f32 %v2281_v29, %v1207_v59  ;;  %v1189_v54 = vmul.f32 %v1736_v0, %v1141_v43  ;;  %v1208_v21 = vmul.f32 %v2272_v58, %v1188_v50  ;;  %v1242_v36 = vmax.f32 %v1226_v47, 0.0 }
 0x366   : > { %v1243_v15 = vmax.f32 %v1227_v27, 0.0  ;;  %v1209_v28 = vmul.f32 %v2272_v58, %v1189_v54  ;;  %v1228_v13 = vadd.f32 %v2281_v29, %v1208_v21 }
 0x368   : > { %v1252_v12 = vpack.c.bf16 %v1243_v15, %v1242_v36  ;;  %v1229_v41 = vadd.f32 %v2281_v29, %v1209_v28  ;;  %v1244_v26 = vmax.f32 %v1228_v13, 0.0 }
 0x36a   : > { %1639 = vmatprep.mubr.msk.bf16.mxu0 %vm455_vm1, %v1252_v12  ;;  %v1245_v25 = vmax.f32 %v1229_v41, 0.0 }
 0x36c   : > { %v1253_v49 = vpack.c.bf16 %v1245_v25, %v1244_v26 }
 0x36e   : > { %1640 = vmatmul.mubr.msk.bf16.gmra.mrb[20].mxu0 %vm455_vm1, %v1253_v49 }
 0x40e   : > { %v1629_v58 = vpop.f32.mrb[8].mxu0 }
 0x40f   : > { %v1360_v29 = vadd.f32 %v1629_v58, %v1526_v19  ;;  %v1351_v5 = vpop.f32.mrb[9].mxu0 }
 0x410   : > { %v1352_v30 = vadd.f32 %v1526_v19, %v1351_v5  ;;  %v1630_v60 = vpop.f32.mrb[10].mxu0 }
 0x411   : > { %1417 = vst.msk [vmem:[%s2394_s11 + $0x10] sm:$0xff] %vm1414_vm2, %v1360_v29  ;;  %v1363_v48 = vadd.f32 %v1630_v60, %v1526_v19  ;;  %v1354_v22 = vpop.f32.mrb[11].mxu0 }
 0x412   : > { %1415 = vst.msk [vmem:[%s2394_s11] sm:$0xff] %vm1414_vm2, %v1352_v30  ;;  %v1355_v11 = vadd.f32 %v1526_v19, %v1354_v22 }
 0x413   : > { %1418 = vst.msk [vmem:[%s2394_s11 + $0x18] sm:$0xff] %vm1414_vm2, %v1363_v48 }
 0x414   : > { %1416 = vst.msk [vmem:[%s2394_s11 + $0x8] sm:$0xff] %vm1414_vm2, %v1355_v11 }
 0x422   : > { %v1633_v32 = vpop.f32.mrb[12].mxu0 }
 0x423   : > { %v1376_v4 = vadd.f32 %v1633_v32, %v1526_v19  ;;  %v1367_v33 = vpop.f32.mrb[13].mxu0 }
 0x424   : > { %v1368_v34 = vadd.f32 %v1526_v19, %v1367_v33  ;;  %v1634_v37 = vpop.f32.mrb[14].mxu0 }
 0x425   : > { %1421 = vst.msk [vmem:[%s2394_s11 + $0x30] sm:$0xff] %vm1414_vm2, %v1376_v4  ;;  %v1379_v40 = vadd.f32 %v1634_v37, %v1526_v19  ;;  %v1370_v56 = vpop.f32.mrb[15].mxu0 }
 0x426   : > { %1419 = vst.msk [vmem:[%s2394_s11 + $0x20] sm:$0xff] %vm1414_vm2, %v1368_v34  ;;  %v1371_v9 = vadd.f32 %v1526_v19, %v1370_v56 }
 0x427   : > { %1422 = vst.msk [vmem:[%s2394_s11 + $0x38] sm:$0xff] %vm1414_vm2, %v1379_v40 }
 0x428   : > { %1420 = vst.msk [vmem:[%s2394_s11 + $0x28] sm:$0xff] %vm1414_vm2, %v1371_v9 }
 0x432   : > { %v1637_v42 = vpop.f32.mrb[16].mxu0 }
 0x433   : > { %v1392_v35 = vadd.f32 %v1637_v42, %v1526_v19  ;;  %v1383_v45 = vpop.f32.mrb[17].mxu0 }
 0x434   : > { %v1384_v61 = vadd.f32 %v1526_v19, %v1383_v45  ;;  %v1638_v44 = vpop.f32.mrb[18].mxu0 }
 0x435   : > { %1425 = vst.msk [vmem:[%s2394_s11 + $0x50] sm:$0xff] %vm1414_vm2, %v1392_v35  ;;  %v1395_v31 = vadd.f32 %v1638_v44, %v1526_v19  ;;  %v1386_v38 = vpop.f32.mrb[19].mxu0 }
 0x436   : > { %1423 = vst.msk [vmem:[%s2394_s11 + $0x40] sm:$0xff] %vm1414_vm2, %v1384_v61  ;;  %v1387_v8 = vadd.f32 %v1526_v19, %v1386_v38 }
 0x437   : > { %1426 = vst.msk [vmem:[%s2394_s11 + $0x58] sm:$0xff] %vm1414_vm2, %v1395_v31 }
 0x438   : > { %1424 = vst.msk [vmem:[%s2394_s11 + $0x48] sm:$0xff] %vm1414_vm2, %v1387_v8 }
 0x441   : > { %v1641_v14 = vpop.f32.mrb[20].mxu0 }
 0x442   : > { %v1408_v57 = vadd.f32 %v1641_v14, %v1526_v19  ;;  %v1399_v46 = vpop.f32.mrb[21].mxu0 }
 0x443   : > { %v1400_v63 = vadd.f32 %v1526_v19, %v1399_v46  ;;  %v1642_v3 = vpop.f32.mrb[22].mxu0 }
 0x444   : > { %1429 = vst.msk [vmem:[%s2394_s11 + $0x70] sm:$0xff] %vm1414_vm2, %v1408_v57  ;;  %v1411_v2 = vadd.f32 %v1642_v3, %v1526_v19  ;;  %v1402_v52 = vpop.f32.mrb[23].mxu0 }
 0x445   : > { %1427 = vst.msk [vmem:[%s2394_s11 + $0x60] sm:$0xff] %vm1414_vm2, %v1400_v63  ;;  %v1403_v55 = vadd.f32 %v1526_v19, %v1402_v52 }
 0x446   : > { %1430 = vst.msk [vmem:[%s2394_s11 + $0x78] sm:$0xff] %vm1414_vm2, %v1411_v2 }
 0x447   : > { %1428 = vst.msk [vmem:[%s2394_s11 + $0x68] sm:$0xff] %vm1414_vm2, %v1403_v55 }
 0x448 PF: > { %s16_s21 = sadd.s32 1, %s1744_s21  }
 0x449   : > { %p13_p4 = scmp.ge.s32.totalorder %s16_s21, 6  }
 0x44b   :  { %15 = sbr.rel (!%p13_p4) target bundleno = 1 (0x1), region = 74 }

// kernel: tpu_custom_call.1
= control target key start
LH: loop header
LB: loop body
LE: loop exit
PB: predicated region body
PF: predicated region fallthrough
CT: control target
= control target key end

     0   :  { %s1781_s21 = smov 0   ;;  %s2431_s0 = inlined_call_operand.vmem [shape: bf16[512,32], index: 0, kind: input, shape index: {}]   ;;  %s2432_s1 = inlined_call_operand.vmem [shape: bf16[32,64], index: 1, kind: input, shape index: {}]   ;;  %s2433_s2 = inlined_call_operand.vmem [shape: bf16[64,64], index: 2, kind: input, shape index: {}]   ;;  %s2434_s3 = inlined_call_operand.vmem [shape: f32[6,64], index: 3, kind: input, shape index: {}]   ;;  %s2435_s4 = inlined_call_operand.vmem [shape: bf16[64,16], index: 4, kind: input, shape index: {}]   ;;  %s2436_s5 = inlined_call_operand.vmem [shape: f32[1,16], index: 5, kind: input, shape index: {}]   ;;  %s2437_s6 = inlined_call_operand.vmem [shape: f32[512,16], index: 6, kind: output, shape index: {}]  }
   0x1 LB: > { %s1487_s22 = sadd.s32 4294967295, %s1744_s21   ;;  %p1491_p0 = scmp.ge.s32.totalorder %s1744_s21, 1  ;;  %s1744_s21 = sphi %s1781_s21, %s16_s21  }
   0x2   : > { %p213_p1 = scmp.lt.s32.totalorder %s1744_s21, 5 }
   0x4   : > { %p214_p2 = pnand %p1491_p0, %p213_p1 }
   0x5   : > { %v1655_v0 = vld [vmem:[%s2432_s1] sm:$0xff] (!%p214_p2)   ;;  %s1492_s25 = sshll.u32 (!%p214_p2), %s1487_s22, 4  ;;  %v1656_v1 = vld [vmem:[%s2432_s1 + $0x8] sm:$0xff] (!%p214_p2)   ;;  %vm333_vm0 = vcmask (!%p214_p2), 261120   ;;  %v277_v10 = vlaneseq (!%p214_p2)  ;;  %vm455_vm1 = vcmask (!%p214_p2), 523264   ;;  %vm1414_vm2 = vcmask (!%p214_p2), 130048  }
   0x6   : > { %217 = sbr.rel (%p214_p2) target bundleno = 1096 (0x448), region = 44  ;;  %p244_p3 = scmp.lt.s32.totalorder (!%p214_p2), %s1492_s25, 63  ;;  %1575 = vmatprep.subr.bf16.mxu0 (!%p214_p2), %v1655_v0  ;;  %1643 = vmatprep.subr.bf16.mxu1 (!%p214_p2), %v1655_v0  ;;  %v1815_v13 = vld [vmem:[%s2434_s3] sm:$0x3f] (!%p214_p2) }
   0x7   : > { %1576 = vmatpush3.bf16.msra.mxu0 (!%p214_p2), %v1655_v0  ;;  %1645 = vmatpush3.bf16.msra.mxu1 (!%p214_p2), %v1655_v0  ;;  %v1809_v11 = vshrl.u32 (!%p214_p2), %v277_v10, 7 }
   0x8   : > { %1577 = vmatprep.subr.bf16.mxu0 (!%p214_p2), %v1656_v1  ;;  %1644 = vmatprep.subr.bf16.mxu1 (!%p214_p2), %v1656_v1 }
   0x9   : > { %v279_v12 = vsub.s32 (!%p214_p2), 0, %v1809_v11 }
   0xb   : > { %1578 = vmatpush3.bf16.msra.mxu0 (!%p214_p2), %v1656_v1  ;;  %1646 = vmatpush3.bf16.msra.mxu1 (!%p214_p2), %v1656_v1  ;;  %v1818_v14 = vrot.slane (!%p214_p2), %v1815_v13, %v279_v12 }
   0xd   : > { %s2439_s25 = smov (!%p244_p3, %s1492_s25), 63 }
   0xe   : > { %s1493_s28 = sshll.u32 %s2439_s25, 2  ;;  %s1495_s30 = sshll.u32 %s2439_s25, 3 }
   0xf   : > { %s247_s7 = scalar_lea.vmem %s2431_s0, %s1493_s28  ;;  %s2394_s11 = scalar_lea.vmem %s2437_s6, %s1495_s30 }
  0x10   : > { %v1657_v2 = vld [vmem:[%s247_s7] sm:$0xff]   ;;  %v1659_v4 = vld [vmem:[%s247_s7 + $0x8] sm:$0xff]   ;;  %v1661_v6 = vld [vmem:[%s247_s7 + $0x10] sm:$0xff]  }
  0x11   : > { %v1658_v3 = vld [vmem:[%s247_s7 + $0x20] sm:$0xff]   ;;  %1579 = vmatprep.mubr.msk.bf16.mxu0 %vm333_vm0, %v1657_v2  ;;  %v1660_v5 = vld [vmem:[%s247_s7 + $0x28] sm:$0xff]   ;;  %v1662_v7 = vld [vmem:[%s247_s7 + $0x18] sm:$0xff]  }
  0x12   : > { %1587 = vmatprep.mubr.msk.bf16.mxu1 %vm333_vm0, %v1658_v3  ;;  %1580 = vmatmul.mubr.msk.bf16.vlgmr.msra.gmra.mrb[0].mxu0 %vm333_vm0, %v1659_v4  ;;  %v1663_v8 = vld [vmem:[%s247_s7 + $0x30] sm:$0xff]   ;;  %v1664_v9 = vld [vmem:[%s247_s7 + $0x38] sm:$0xff]  }
  0x13   : > { %1588 = vmatmul.mubr.msk.bf16.vlgmr.msra.gmra.mrb[0].mxu1 %vm333_vm0, %v1660_v5  ;;  %1583 = vmatprep.mubr.msk.bf16.mxu0 %vm333_vm0, %v1661_v6 }
  0x14   : > { %1591 = vmatprep.mubr.msk.bf16.mxu1 %vm333_vm0, %v1663_v8 }
  0x1a   : > { %1584 = vmatmul.mubr.msk.bf16.gmra.mrb[4].mxu0 %vm333_vm0, %v1662_v7 }
  0x1b   : > { %1592 = vmatmul.mubr.msk.bf16.gmra.mrb[4].mxu1 %vm333_vm0, %v1664_v9 }
  0xe5   : > { %v1581_v15 = vpop.f32.mrb[0].mxu0 }
  0xe6   : > { %v1821_v16 = vadd.f32 %v1581_v15, %v1818_v14  ;;  %v1589_v17 = vpop.f32.mrb[0].mxu1  ;;  %v392_v18 = vpop.f32.mrb[1].mxu0 }
  0xe7   : > { %v1824_v19 = vadd.f32 %v1589_v17, %v1818_v14  ;;  %v424_v20 = vpop.f32.mrb[1].mxu1  ;;  %v1582_v21 = vpop.f32.mrb[2].mxu0  ;;  %v1832_v26 = vadd.f32 %v392_v18, %v1818_v14 }
  0xe8   : > { %v1827_v22 = vadd.f32 %v1582_v21, %v1818_v14  ;;  %v1590_v23 = vpop.f32.mrb[2].mxu1  ;;  %v395_v24 = vpop.f32.mrb[3].mxu0  ;;  %v462_v25 = vsel %vm455_vm1, %v1821_v16, 0.0  ;;  %v1842_v31 = vadd.f32 %v424_v20, %v1818_v14  ;;  %v523_v43 = vmul.f32 %v1821_v16, %v1821_v16 }
  0xe9   : > { %v427_v27 = vpop.f32.mrb[3].mxu1  ;;  %v486_v28 = vsel %vm455_vm1, %v1824_v19, 0.0  ;;  %463 = vadd.xlane.f32.xlu1 %v462_v25  ;;  %v1837_v29 = vadd.f32 %v1590_v23, %v1818_v14  ;;  %v456_v32 = vsel %vm455_vm1, %v1832_v26, 0.0  ;;  %v1858_v45 = vadd.f32 %v395_v24, %v1818_v14 }
  0xea   : > { %487 = vadd.xlane.f32.xlu0 %v486_v28  ;;  %v465_v30 = vsel %vm455_vm1, %v1827_v22, 0.0  ;;  %v1849_v38 = vadd.f32 %v427_v27, %v1818_v14  ;;  %v480_v42 = vsel %vm455_vm1, %v1842_v31, 0.0  ;;  %v524_v47 = vmul.f32 %v1827_v22, %v1827_v22 }
  0xeb   : > { %v489_v39 = vsel %vm455_vm1, %v1837_v29, 0.0  ;;  %v543_v48 = vsel %vm455_vm1, %v523_v43, 0.0  ;;  %v522_v50 = vmul.f32 %v1858_v45, %v1858_v45  ;;  %v459_v51 = vsel %vm455_vm1, %v1858_v45, 0.0  ;;  %v1668_v43 = vld [vmem:[%s2433_s2 + $0x18] sm:$0xff]  }
  0xec   : > { %v483_v46 = vsel %vm455_vm1, %v1849_v38, 0.0  ;;  %v546_v49 = vsel %vm455_vm1, %v524_v47, 0.0  ;;  %v521_v52 = vmul.f32 %v1832_v26, %v1832_v26  ;;  %v530_v54 = vmul.f32 %v1849_v38, %v1849_v38 }
  0xed   : > { %466 = vadd.xlane.f32.xlu1 %v465_v30  ;;  %v1585_v33 = vpop.f32.mrb[4].mxu0  ;;  %v540_v53 = vsel %vm455_vm1, %v522_v50, 0.0  ;;  %v529_v56 = vmul.f32 %v1842_v31, %v1842_v31  ;;  %v532_v10 = vmul.f32 %v1837_v29, %v1837_v29  ;;  %v531_v15 = vmul.f32 %v1824_v19, %v1824_v19 }
  0xee   : > { %457 = vadd.xlane.f32.xlu0 %v456_v32  ;;  %v408_v34 = vpop.f32.mrb[5].mxu0  ;;  %v1846_v35 = vpop.f32.mrb[4].mxu1  ;;  %v537_v55 = vsel %vm455_vm1, %v521_v52, 0.0  ;;  %v564_v58 = vsel %vm455_vm1, %v530_v54, 0.0  ;;  %v1883_v59 = vadd.f32 %v1585_v33, %v1818_v14 }
  0xef   : > { %v1586_v36 = vpop.f32.mrb[6].mxu0  ;;  %v440_v37 = vpop.f32.mrb[5].mxu1  ;;  %v561_v60 = vsel %vm455_vm1, %v529_v56, 0.0  ;;  %v1892_v63 = vadd.f32 %v408_v34, %v1818_v14  ;;  %v570_v20 = vsel %vm455_vm1, %v532_v10, 0.0  ;;  %v567_v21 = vsel %vm455_vm1, %v531_v15, 0.0 }
  0xf0   : > { %v411_v40 = vpop.f32.mrb[7].mxu0  ;;  %v1594_v41 = vpop.f32.mrb[6].mxu1  ;;  %v1879_v57 = vadd.f32 %v1586_v36, %v1818_v14  ;;  %v474_v0 = vsel %vm455_vm1, %v1883_v59, 0.0  ;;  %v527_v4 = vmul.f32 %v1883_v59, %v1883_v59  ;;  %v1920_v18 = vadd.f32 %v440_v37, %v1818_v14 }
  0xf1   : > { %490 = vadd.xlane.f32.xlu1 %v489_v39  ;;  %v443_v44 = vpop.f32.mrb[7].mxu1  ;;  %v1887_v61 = vadd.f32 %v411_v40, %v1818_v14  ;;  %v468_v3 = vsel %vm455_vm1, %v1892_v63, 0.0  ;;  %v525_v8 = vmul.f32 %v1892_v63, %v1892_v63  ;;  %v1925_v23 = vadd.f32 %v1594_v41, %v1818_v14  ;;  %v1666_v39 = vld [vmem:[%s2433_s2 + $0x8] sm:$0xff]  }
  0xf2   : > { %481 = vadd.xlane.f32.xlu0 %v480_v42  ;;  %v477_v62 = vsel %vm455_vm1, %v1879_v57, 0.0  ;;  %v528_v2 = vmul.f32 %v1879_v57, %v1879_v57  ;;  %v555_v7 = vsel %vm455_vm1, %v527_v4, 0.0  ;;  %v1917_v17 = vadd.f32 %v443_v44, %v1818_v14  ;;  %v1667_v42 = vld [vmem:[%s2433_s2 + $0x10] sm:$0xff]  }
  0xf3   : > { %v471_v1 = vsel %vm455_vm1, %v1887_v61, 0.0  ;;  %v526_v6 = vmul.f32 %v1887_v61, %v1887_v61  ;;  %v549_v12 = vsel %vm455_vm1, %v525_v8, 0.0  ;;  %v1931_v25 = vadd.f32 %v1846_v35, %v1818_v14  ;;  %v1665_v14 = vld [vmem:[%s2433_s2] sm:$0xff]  }
  0xf4   : > { %v558_v5 = vsel %vm455_vm1, %v528_v2, 0.0  ;;  %v495_v24 = vsel %vm455_vm1, %v1917_v17, 0.0  ;;  %v492_v27 = vsel %vm455_vm1, %v1920_v18, 0.0  ;;  %v501_v28 = vsel %vm455_vm1, %v1925_v23, 0.0  ;;  %1595 = vmatprep.subr.bf16.mxu1 %v1665_v14 }
  0xf5   : > { %484 = vadd.xlane.f32.xlu1 %v483_v46  ;;  %v552_v9 = vsel %vm455_vm1, %v526_v6, 0.0  ;;  %v534_v30 = vmul.f32 %v1917_v17, %v1917_v17  ;;  %v498_v32 = vsel %vm455_vm1, %v1931_v25, 0.0  ;;  %v533_v33 = vmul.f32 %v1920_v18, %v1920_v18  ;;  %1596 = vmatpush3.bf16.msra.mxu1 %v1665_v14 }
  0xf6   : > { %544 = vadd.xlane.f32.xlu0 %v543_v48  ;;  %v536_v35 = vmul.f32 %v1925_v23, %v1925_v23  ;;  %v535_v37 = vmul.f32 %v1931_v25, %v1931_v25  ;;  %1597 = vmatprep.subr.bf16.mxu1 %v1666_v39 }
  0xf7   : > { %v576_v34 = vsel %vm455_vm1, %v534_v30, 0.0  ;;  %v573_v36 = vsel %vm455_vm1, %v533_v33, 0.0 }
  0xf8   : > { %v582_v40 = vsel %vm455_vm1, %v536_v35, 0.0  ;;  %v579_v41 = vsel %vm455_vm1, %v535_v37, 0.0 }
  0xf9   : > { %547 = vadd.xlane.f32.xlu1 %v546_v49  ;;  %1598 = vmatpush3.bf16.msra.mxu1 %v1666_v39 }
  0xfa   : > { %460 = vadd.xlane.f32.xlu0 %v459_v51  ;;  %1599 = vmatprep.subr.bf16.mxu1 %v1667_v42 }
  0xfd   : > { %541 = vadd.xlane.f32.xlu1 %v540_v53  ;;  %1600 = vmatpush3.bf16.msra.mxu1 %v1667_v42 }
  0xfe   : > { %538 = vadd.xlane.f32.xlu0 %v537_v55  ;;  %1601 = vmatprep.subr.bf16.mxu1 %v1668_v43 }
 0x101   : > { %565 = vadd.xlane.f32.xlu1 %v564_v58  ;;  %1602 = vmatpush3.bf16.msra.mxu1 %v1668_v43 }
 0x102   : > { %562 = vadd.xlane.f32.xlu0 %v561_v60 }
 0x105   : > { %478 = vadd.xlane.f32.xlu1 %v477_v62 }
 0x106   : > { %475 = vadd.xlane.f32.xlu0 %v474_v0 }
 0x109   : > { %472 = vadd.xlane.f32.xlu1 %v471_v1 }
 0x10a   : > { %469 = vadd.xlane.f32.xlu0 %v468_v3 }
 0x10d   : > { %559 = vadd.xlane.f32.xlu1 %v558_v5 }
 0x10e   : > { %556 = vadd.xlane.f32.xlu0 %v555_v7 }
 0x111   : > { %553 = vadd.xlane.f32.xlu1 %v552_v9 }
 0x112   : > { %550 = vadd.xlane.f32.xlu0 %v549_v12 }
 0x115   : > { %571 = vadd.xlane.f32.xlu1 %v570_v20 }
 0x116   : > { %568 = vadd.xlane.f32.xlu0 %v567_v21 }
 0x119   : > { %496 = vadd.xlane.f32.xlu1 %v495_v24 }
 0x11a   : > { %493 = vadd.xlane.f32.xlu0 %v492_v27 }
 0x11d   : > { %502 = vadd.xlane.f32.xlu1 %v501_v28 }
 0x11e   : > { %499 = vadd.xlane.f32.xlu0 %v498_v32 }
 0x121   : > { %577 = vadd.xlane.f32.xlu1 %v576_v34 }
 0x122   : > { %574 = vadd.xlane.f32.xlu0 %v573_v36 }
 0x125   : > { %583 = vadd.xlane.f32.xlu1 %v582_v40 }
 0x126   : > { %580 = vadd.xlane.f32.xlu0 %v579_v41 }
 0x176   : > { %v464_v44 = vpop.xlane.xlu1 %463 }
 0x177   : > { %v1963_v46 = vpop.xlane.xlu0 %487  ;;  %v1967_v51 = vmul.f32 0.015625, %v464_v44 }
 0x179   : > { %v603_v55 = vmul.f32 %v1967_v51, %v1967_v51 }
 0x17a   : > { %v467_v47 = vpop.xlane.xlu1 %466 }
 0x17b   : > { %v458_v48 = vpop.xlane.xlu0 %457  ;;  %v1969_v53 = vmul.f32 0.015625, %v467_v47 }
 0x17c   : > { %v1975_v2 = vmul.f32 0.015625, %v458_v48 }
 0x17d   : > { %v604_v62 = vmul.f32 %v1969_v53, %v1969_v53 }
 0x17e   : > { %v1965_v49 = vpop.xlane.xlu1 %490  ;;  %v601_v20 = vmul.f32 %v1975_v2, %v1975_v2 }
 0x17f   : > { %v482_v50 = vpop.xlane.xlu0 %481 }
 0x180   : > { %v1985_v21 = vmul.f32 0.015625, %v482_v50 }
 0x182   : > { %v485_v52 = vpop.xlane.xlu1 %484  ;;  %v609_v36 = vmul.f32 %v1985_v21, %v1985_v21 }
 0x183   : > { %v545_v54 = vpop.xlane.xlu0 %544  ;;  %v1979_v8 = vmul.f32 0.015625, %v485_v52  ;;  %v735_v52 = vsub.s32 2, %v1809_v11 }
 0x184   : > { %v587_v56 = vmul.f32 0.015625, %v545_v54  ;;  %v715_v54 = vsub.s32 1, %v1809_v11 }
 0x185   : > { %v610_v33 = vmul.f32 %v1979_v8, %v1979_v8 }
 0x186   : > { %v619_v58 = vsub.f32 %v587_v56, %v603_v55  ;;  %v548_v60 = vpop.xlane.xlu1 %547 }
 0x187   : > { %v588_v0 = vmul.f32 0.015625, %v548_v60  ;;  %v461_v1 = vpop.xlane.xlu0 %460  ;;  %v651_v60 = vsub.f32 %v1821_v16, %v1967_v51  ;;  %v2011_v16 = vmul.f32 0.015625, %v1965_v49 }
 0x188   : > { %v635_v3 = vmax.f32 %v619_v58, 0.0  ;;  %v1977_v4 = vmul.f32 0.015625, %v461_v1 }
 0x189   : > { %v620_v5 = vsub.f32 %v588_v0, %v604_v62 }
 0x18a   : > { %v667_v6 = vadd.f32 1e-05, %v635_v3  ;;  %v542_v7 = vpop.xlane.xlu1 %541  ;;  %v602_v10 = vmul.f32 %v1977_v4, %v1977_v4  ;;  %v652_v3 = vsub.f32 %v1827_v22, %v1969_v53 }
 0x18b   : > { %v636_v9 = vmax.f32 %v620_v5, 0.0  ;;  %v586_v12 = vmul.f32 0.015625, %v542_v7  ;;  %v539_v15 = vpop.xlane.xlu0 %538  ;;  %v2002_v7 = vrot.slane %v1815_v13, %v735_v52 }
 0x18c   : > { %1673 = vrsqrt.f32 %v667_v6  ;;  %v585_v24 = vmul.f32 0.015625, %v539_v15  ;;  %v650_v15 = vsub.f32 %v1858_v45, %v1977_v4  ;;  %v649_v4 = vsub.f32 %v1832_v26, %v1975_v2 }
 0x18d   : > { %v668_v27 = vadd.f32 1e-05, %v636_v9  ;;  %v618_v28 = vsub.f32 %v586_v12, %v602_v10  ;;  %v2005_v9 = vmul.f32 0.015625, %v1963_v46  ;;  %v2008_v10 = vrot.slane %v1815_v13, %v715_v54 }
 0x18e   : > { %v617_v30 = vsub.f32 %v585_v24, %v601_v20  ;;  %v566_v32 = vpop.xlane.xlu1 %565 }
 0x18f   : > { %1675 = vrsqrt.f32 %v668_v27  ;;  %v634_v14 = vmax.f32 %v618_v28, 0.0  ;;  %v594_v34 = vmul.f32 0.015625, %v566_v32  ;;  %v563_v35 = vpop.xlane.xlu0 %562  ;;  %v611_v45 = vmul.f32 %v2005_v9, %v2005_v9 }
 0x190   : > { %v633_v37 = vmax.f32 %v617_v30, 0.0  ;;  %v593_v39 = vmul.f32 0.015625, %v563_v35  ;;  %v612_v35 = vmul.f32 %v2011_v16, %v2011_v16 }
 0x191   : > { %v666_v40 = vadd.f32 1e-05, %v634_v14  ;;  %v626_v41 = vsub.f32 %v594_v34, %v610_v33 }
 0x192   : > { %v665_v42 = vadd.f32 1e-05, %v633_v37  ;;  %v625_v43 = vsub.f32 %v593_v39, %v609_v36  ;;  %v479_v44 = vpop.xlane.xlu1 %478 }
 0x193   : > { %1677 = vrsqrt.f32 %v666_v40  ;;  %v476_v47 = vpop.xlane.xlu0 %475  ;;  %v642_v48 = vmax.f32 %v626_v41, 0.0  ;;  %v1993_v56 = vmul.f32 0.015625, %v479_v44 }
 0x194   : > { %1679 = vrsqrt.f32 %v665_v42  ;;  %v641_v50 = vmax.f32 %v625_v43, 0.0  ;;  %v1997_v0 = vmul.f32 0.015625, %v476_v47 }
 0x195   : > { %v674_v5 = vadd.f32 1e-05, %v642_v48  ;;  %v608_v22 = vmul.f32 %v1993_v56, %v1993_v56 }
 0x196   : > { %v1674_v55 = vpop.eup %1673  ;;  %v473_v58 = vpop.xlane.xlu1 %472  ;;  %v673_v62 = vadd.f32 1e-05, %v641_v50  ;;  %v607_v46 = vmul.f32 %v1997_v0, %v1997_v0 }
 0x197   : > { %v470_v1 = vpop.xlane.xlu0 %469  ;;  %v699_v12 = vmul.f32 %v1674_v55, %v651_v60  ;;  %v2019_v20 = vmul.f32 0.015625, %v473_v58 }
 0x198   : > { %1681 = vrsqrt.f32 %v673_v62  ;;  %v2022_v49 = vmul.f32 0.015625, %v470_v1 }
 0x199   : > { %v1676_v6 = vpop.eup %1675  ;;  %1683 = vrsqrt.f32 %v674_v5  ;;  %v719_v33 = vmul.f32 %v2008_v10, %v699_v12  ;;  %v606_v41 = vmul.f32 %v2019_v20, %v2019_v20 }
 0x19a   : > { %v700_v51 = vmul.f32 %v1676_v6, %v652_v3  ;;  %v560_v53 = vpop.xlane.xlu1 %559  ;;  %v605_v26 = vmul.f32 %v2022_v49, %v2022_v49 }
 0x19b   : > { %v592_v24 = vmul.f32 0.015625, %v560_v53  ;;  %v557_v27 = vpop.xlane.xlu0 %556  ;;  %v739_v52 = vadd.f32 %v2002_v7, %v719_v33 }
 0x19c   : > { %v720_v28 = vmul.f32 %v2008_v10, %v700_v51  ;;  %v591_v30 = vmul.f32 0.015625, %v557_v27 }
 0x19d   : > { %v1678_v32 = vpop.eup %1677  ;;  %v624_v14 = vsub.f32 %v592_v24, %v608_v22 }
 0x19e   : > { %v1680_v34 = vpop.eup %1679  ;;  %v740_v36 = vadd.f32 %v2002_v7, %v720_v28  ;;  %v623_v37 = vsub.f32 %v591_v30, %v607_v46  ;;  %v554_v39 = vpop.xlane.xlu1 %553  ;;  %v698_v40 = vmul.f32 %v1678_v32, %v650_v15 }
 0x19f   : > { %v640_v42 = vmax.f32 %v624_v14, 0.0  ;;  %v590_v43 = vmul.f32 0.015625, %v554_v39  ;;  %v551_v44 = vpop.xlane.xlu0 %550  ;;  %v697_v47 = vmul.f32 %v1680_v34, %v649_v4  ;;  %v657_v4 = vsub.f32 %v1842_v31, %v1985_v21 }
 0x1a0   : > { %v639_v2 = vmax.f32 %v623_v37, 0.0  ;;  %v589_v48 = vmul.f32 0.015625, %v551_v44  ;;  %v718_v50 = vmul.f32 %v2008_v10, %v698_v40  ;;  %v756_v5 = vmax.f32 %v740_v36, 0.0 }
 0x1a1   : > { %v672_v54 = vadd.f32 1e-05, %v640_v42  ;;  %v622_v55 = vsub.f32 %v590_v43, %v606_v41  ;;  %v717_v58 = vmul.f32 %v2008_v10, %v697_v47  ;;  %v755_v36 = vmax.f32 %v739_v52, 0.0 }
 0x1a2   : > { %v671_v60 = vadd.f32 1e-05, %v639_v2  ;;  %v621_v62 = vsub.f32 %v589_v48, %v605_v26  ;;  %v572_v1 = vpop.xlane.xlu1 %571  ;;  %v738_v3 = vadd.f32 %v2002_v7, %v718_v50  ;;  %v1682_v24 = vpop.eup %1681  ;;  %v658_v37 = vsub.f32 %v1849_v38, %v1979_v8 }
 0x1a3   : > { %1685 = vrsqrt.f32 %v672_v54  ;;  %v638_v6 = vmax.f32 %v622_v55, 0.0  ;;  %v596_v12 = vmul.f32 0.015625, %v572_v1  ;;  %v569_v51 = vpop.xlane.xlu0 %568  ;;  %v737_v15 = vadd.f32 %v2002_v7, %v717_v58  ;;  %v1684_v32 = vpop.eup %1683 }
 0x1a4   : > { %1687 = vrsqrt.f32 %v671_v60  ;;  %v637_v22 = vmax.f32 %v621_v62, 0.0  ;;  %v595_v53 = vmul.f32 0.015625, %v569_v51  ;;  %v754_v46 = vmax.f32 %v738_v3, 0.0 }
 0x1a5   : > { %v670_v27 = vadd.f32 1e-05, %v638_v6  ;;  %v628_v28 = vsub.f32 %v596_v12, %v612_v35  ;;  %v753_v30 = vmax.f32 %v737_v15, 0.0  ;;  %v770_v43 = vpack.c.bf16 %v756_v5, %v755_v36 }
 0x1a6   : > { %v669_v33 = vadd.f32 1e-05, %v637_v22  ;;  %v627_v14 = vsub.f32 %v595_v53, %v611_v45  ;;  %v497_v34 = vpop.xlane.xlu1 %496  ;;  %v705_v35 = vmul.f32 %v1682_v24, %v657_v4  ;;  %v706_v47 = vmul.f32 %v1684_v32, %v658_v37 }
 0x1a7   : > { %1689 = vrsqrt.f32 %v670_v27  ;;  %v644_v39 = vmax.f32 %v628_v28, 0.0  ;;  %v494_v40 = vpop.xlane.xlu0 %493  ;;  %v769_v41 = vpack.c.bf16 %v754_v46, %v753_v30  ;;  %v2047_v45 = vmul.f32 0.015625, %v497_v34 }
 0x1a8   : > { %1691 = vrsqrt.f32 %v669_v33  ;;  %v643_v42 = vmax.f32 %v627_v14, 0.0  ;;  %v656_v8 = vsub.f32 %v1879_v57, %v1993_v56  ;;  %v2051_v26 = vmul.f32 0.015625, %v494_v40 }
 0x1a9   : > { %v676_v44 = vadd.f32 1e-05, %v644_v39  ;;  %1603 = vmatprep.mubr.msk.bf16.mxu1 %vm455_vm1, %v769_v41  ;;  %v725_v2 = vmul.f32 %v2008_v10, %v705_v35  ;;  %v659_v50 = vsub.f32 %v1824_v19, %v2005_v9  ;;  %v655_v52 = vsub.f32 %v1883_v59, %v1997_v0 }
 0x1aa   : > { %v675_v31 = vadd.f32 1e-05, %v643_v42  ;;  %1604 = vmatmul.mubr.msk.bf16.vlgmr.msra.gmra.mrb[8].mxu1 %vm455_vm1, %v770_v43  ;;  %v503_v21 = vpop.xlane.xlu1 %502  ;;  %v614_v54 = vmul.f32 %v2047_v45, %v2047_v45  ;;  %v726_v55 = vmul.f32 %v2008_v10, %v706_v47  ;;  %v660_v57 = vsub.f32 %v1837_v29, %v2011_v16 }
 0x1ab   : > { %1693 = vrsqrt.f32 %v676_v44  ;;  %v500_v38 = vpop.xlane.xlu0 %499  ;;  %v654_v56 = vsub.f32 %v1887_v61, %v2019_v20  ;;  %v613_v60 = vmul.f32 %v2051_v26, %v2051_v26  ;;  %v653_v59 = vsub.f32 %v1892_v63, %v2022_v49 }
 0x1ac   : > { %1695 = vrsqrt.f32 %v675_v31  ;;  %v2069_v0 = vmul.f32 0.015625, %v503_v21  ;;  %v2071_v5 = vmul.f32 0.015625, %v500_v38  ;;  %v745_v61 = vadd.f32 %v2002_v7, %v725_v2 }
 0x1ad   : > { %v1686_v48 = vpop.eup %1685  ;;  %v746_v63 = vadd.f32 %v2002_v7, %v726_v55 }
 0x1ae   : > { %v1688_v58 = vpop.eup %1687  ;;  %v578_v62 = vpop.xlane.xlu1 %577  ;;  %v704_v19 = vmul.f32 %v1686_v48, %v656_v8  ;;  %v616_v20 = vmul.f32 %v2069_v0, %v2069_v0  ;;  %v615_v15 = vmul.f32 %v2071_v5, %v2071_v5  ;;  %v761_v36 = vmax.f32 %v745_v61, 0.0 }
 0x1af   : > { %v598_v9 = vmul.f32 0.015625, %v578_v62  ;;  %v575_v1 = vpop.xlane.xlu0 %574  ;;  %v703_v3 = vmul.f32 %v1688_v58, %v655_v52  ;;  %v762_v58 = vmax.f32 %v746_v63, 0.0  ;;  %v661_v61 = vsub.f32 %v1920_v18, %v2051_v26 }
 0x1b0   : > { %v597_v6 = vmul.f32 0.015625, %v575_v1  ;;  %v724_v29 = vmul.f32 %v2008_v10, %v704_v19 }
 0x1b1   : > { %v1690_v16 = vpop.eup %1689  ;;  %v630_v12 = vsub.f32 %v598_v9, %v614_v54  ;;  %v723_v51 = vmul.f32 %v2008_v10, %v703_v3  ;;  %v773_v1 = vpack.c.bf16 %v762_v58, %v761_v36 }
 0x1b2   : > { %v1692_v49 = vpop.eup %1691  ;;  %v629_v22 = vsub.f32 %v597_v6, %v613_v60  ;;  %v584_v53 = vpop.xlane.xlu1 %583  ;;  %v702_v46 = vmul.f32 %v1690_v16, %v654_v56  ;;  %v744_v24 = vadd.f32 %v2002_v7, %v724_v29 }
 0x1b3   : > { %v646_v27 = vmax.f32 %v630_v12, 0.0  ;;  %v600_v28 = vmul.f32 0.015625, %v584_v53  ;;  %v581_v30 = vpop.xlane.xlu0 %580  ;;  %v701_v32 = vmul.f32 %v1692_v49, %v653_v59  ;;  %v743_v4 = vadd.f32 %v2002_v7, %v723_v51 }
 0x1b4   : > { %v645_v33 = vmax.f32 %v629_v22, 0.0  ;;  %v599_v14 = vmul.f32 0.015625, %v581_v30  ;;  %v722_v34 = vmul.f32 %v2008_v10, %v702_v46  ;;  %v760_v42 = vmax.f32 %v744_v24, 0.0 }
 0x1b5   : > { %v1694_v37 = vpop.eup %1693  ;;  %v678_v39 = vadd.f32 1e-05, %v646_v27  ;;  %v632_v40 = vsub.f32 %v600_v28, %v616_v20  ;;  %v721_v41 = vmul.f32 %v2008_v10, %v701_v32  ;;  %v759_v8 = vmax.f32 %v743_v4, 0.0 }
 0x1b6   : > { %v1696_v43 = vpop.eup %1695  ;;  %v677_v35 = vadd.f32 1e-05, %v645_v33  ;;  %v631_v44 = vsub.f32 %v599_v14, %v615_v15  ;;  %v742_v47 = vadd.f32 %v2002_v7, %v722_v34  ;;  %v708_v31 = vmul.f32 %v1694_v37, %v660_v57 }
 0x1b7   : > { %1697 = vrsqrt.f32 %v678_v39  ;;  %v648_v21 = vmax.f32 %v632_v40, 0.0  ;;  %v741_v38 = vadd.f32 %v2002_v7, %v721_v41  ;;  %v707_v52 = vmul.f32 %v1696_v43, %v659_v50 }
 0x1b8   : > { %1699 = vrsqrt.f32 %v677_v35  ;;  %v647_v2 = vmax.f32 %v631_v44, 0.0  ;;  %v758_v48 = vmax.f32 %v742_v47, 0.0  ;;  %v728_v56 = vmul.f32 %v2008_v10, %v708_v31 }
 0x1b9   : > { %v680_v54 = vadd.f32 1e-05, %v648_v21  ;;  %v757_v55 = vmax.f32 %v741_v38, 0.0  ;;  %v727_v62 = vmul.f32 %v2008_v10, %v707_v52  ;;  %v772_v57 = vpack.c.bf16 %v760_v42, %v759_v8 }
 0x1ba   : > { %v679_v60 = vadd.f32 1e-05, %v647_v2  ;;  %v748_v9 = vadd.f32 %v2002_v7, %v728_v56  ;;  %v662_v50 = vsub.f32 %v1917_v17, %v2047_v45  ;;  %v664_v51 = vsub.f32 %v1925_v23, %v2069_v0 }
 0x1bb   : > { %1701 = vrsqrt.f32 %v680_v54  ;;  %v771_v19 = vpack.c.bf16 %v758_v48, %v757_v55  ;;  %v747_v59 = vadd.f32 %v2002_v7, %v727_v62  ;;  %v663_v22 = vsub.f32 %v1931_v25, %v2071_v5 }
 0x1bc   : > { %1703 = vrsqrt.f32 %v679_v60  ;;  %v764_v6 = vmax.f32 %v748_v9, 0.0  ;;  %v787_v33 = vsub.s32 3, %v1809_v11 }
 0x1bd   : > { %1607 = vmatprep.mubr.msk.bf16.mxu1 %vm455_vm1, %v771_v19  ;;  %v763_v3 = vmax.f32 %v747_v59, 0.0 }
 0x1be   : > { %1608 = vmatmul.mubr.msk.bf16.gmra.mrb[12].mxu1 %vm455_vm1, %v772_v57  ;;  %v2115_v14 = vrot.slane %v1815_v13, %v787_v33 }
 0x1bf   : > { %1611 = vmatprep.mubr.msk.bf16.mxu1 %vm455_vm1, %v773_v1  ;;  %v774_v63 = vpack.c.bf16 %v764_v6, %v763_v3 }
 0x1c1   : > { %v1698_v29 = vpop.eup %1697 }
 0x1c2   : > { %v1700_v16 = vpop.eup %1699  ;;  %v710_v20 = vmul.f32 %v1698_v29, %v662_v50 }
 0x1c3   : > { %v709_v12 = vmul.f32 %v1700_v16, %v661_v61 }
 0x1c4   : > { %v730_v49 = vmul.f32 %v2008_v10, %v710_v20 }
 0x1c5   : > { %v1702_v15 = vpop.eup %1701  ;;  %v729_v17 = vmul.f32 %v2008_v10, %v709_v12 }
 0x1c6   : > { %v1704_v45 = vpop.eup %1703  ;;  %1612 = vmatmul.mubr.msk.bf16.gmra.mrb[16].mxu1 %vm455_vm1, %v774_v63  ;;  %v750_v18 = vadd.f32 %v2002_v7, %v730_v49  ;;  %v712_v26 = vmul.f32 %v1702_v15, %v664_v51 }
 0x1c7   : > { %v749_v53 = vadd.f32 %v2002_v7, %v729_v17  ;;  %v711_v46 = vmul.f32 %v1704_v45, %v663_v22 }
 0x1c8   : > { %v766_v24 = vmax.f32 %v750_v18, 0.0  ;;  %v732_v23 = vmul.f32 %v2008_v10, %v712_v26 }
 0x1c9   : > { %v765_v0 = vmax.f32 %v749_v53, 0.0  ;;  %v731_v27 = vmul.f32 %v2008_v10, %v711_v46 }
 0x1ca   : > { %v752_v28 = vadd.f32 %v2002_v7, %v732_v23 }
 0x1cb   : > { %v775_v25 = vpack.c.bf16 %v766_v24, %v765_v0  ;;  %v751_v5 = vadd.f32 %v2002_v7, %v731_v27 }
 0x1cc   : > { %v768_v30 = vmax.f32 %v752_v28, 0.0 }
 0x1cd   : > { %1615 = vmatprep.mubr.msk.bf16.mxu1 %vm455_vm1, %v775_v25  ;;  %v767_v32 = vmax.f32 %v751_v5, 0.0 }
 0x1cf   : > { %v776_v4 = vpack.c.bf16 %v768_v30, %v767_v32 }
 0x1d1   : > { %1616 = vmatmul.mubr.msk.bf16.gmra.mrb[20].mxu1 %vm455_vm1, %v776_v4  ;;  %v1669_v4 = vld [vmem:[%s2435_s4] sm:$0xff]  }
 0x1d2   : > { %1619 = vmatprep.subr.bf16.mxu0 %v1669_v4 }
 0x1d3   : > { %1620 = vmatpush3.bf16.msra.mxu0 %v1669_v4 }
 0x27d   : > { %v1605_v34 = vpop.f32.mrb[8].mxu1 }
 0x27e   : > { %v2118_v10 = vadd.f32 %v1605_v34, %v2115_v14  ;;  %v871_v36 = vpop.f32.mrb[9].mxu1 }
 0x27f   : > { %v1606_v37 = vpop.f32.mrb[10].mxu1  ;;  %v2121_v7 = vadd.f32 %v871_v36, %v2115_v14 }
 0x280   : > { %v2124_v39 = vadd.f32 %v1606_v37, %v2115_v14  ;;  %v874_v40 = vpop.f32.mrb[11].mxu1  ;;  %v940_v41 = vsel %vm455_vm1, %v2118_v10, 0.0  ;;  %v1000_v35 = vmul.f32 %v2118_v10, %v2118_v10 }
 0x281   : > { %941 = vadd.xlane.f32.xlu0 %v940_v41  ;;  %v2129_v13 = vadd.f32 %v874_v40, %v2115_v14  ;;  %v934_v43 = vsel %vm455_vm1, %v2121_v7, 0.0  ;;  %v998_v21 = vmul.f32 %v2121_v7, %v2121_v7  ;;  %v1670_v40 = vld [vmem:[%s2435_s4 + $0x8] sm:$0xff]  }
 0x282   : > { %v943_v42 = vsel %vm455_vm1, %v2124_v39, 0.0  ;;  %v1001_v47 = vmul.f32 %v2124_v39, %v2124_v39  ;;  %v1020_v31 = vsel %vm455_vm1, %v1000_v35, 0.0  ;;  %1621 = vmatprep.subr.bf16.mxu0 %v1670_v40 }
 0x283   : > { %944 = vadd.xlane.f32.xlu1 %v943_v42  ;;  %v937_v44 = vsel %vm455_vm1, %v2129_v13, 0.0  ;;  %v999_v8 = vmul.f32 %v2129_v13, %v2129_v13  ;;  %v1014_v2 = vsel %vm455_vm1, %v998_v21, 0.0  ;;  %1622 = vmatpush3.bf16.msra.mxu0 %v1670_v40 }
 0x284   : > { %v1023_v38 = vsel %vm455_vm1, %v1001_v47, 0.0 }
 0x285   : > { %935 = vadd.xlane.f32.xlu0 %v934_v43  ;;  %v1017_v48 = vsel %vm455_vm1, %v999_v8, 0.0  ;;  %v1672_v8 = vld [vmem:[%s2435_s4 + $0x18] sm:$0xff]  }
 0x287   : > { %938 = vadd.xlane.f32.xlu1 %v937_v44  ;;  %v1671_v44 = vld [vmem:[%s2435_s4 + $0x10] sm:$0xff]  }
 0x288   : > { %1623 = vmatprep.subr.bf16.mxu0 %v1671_v44 }
 0x289   : > { %1021 = vadd.xlane.f32.xlu0 %v1020_v31  ;;  %1624 = vmatpush3.bf16.msra.mxu0 %v1671_v44  ;;  %v1192_v44 = vsub.s32 4, %v1809_v11 }
 0x28a   : > { %1625 = vmatprep.subr.bf16.mxu0 %v1672_v8 }
 0x28b   : > { %1024 = vadd.xlane.f32.xlu1 %v1023_v38 }
 0x28d   : > { %1015 = vadd.xlane.f32.xlu0 %v1014_v2  ;;  %1626 = vmatpush3.bf16.msra.mxu0 %v1672_v8 }
 0x28f   : > { %1018 = vadd.xlane.f32.xlu1 %v1017_v48 }
 0x291   : > { %v1609_v52 = vpop.f32.mrb[12].mxu1 }
 0x292   : > { %v2150_v54 = vadd.f32 %v1609_v52, %v2115_v14  ;;  %v887_v55 = vpop.f32.mrb[13].mxu1 }
 0x293   : > { %v1610_v58 = vpop.f32.mrb[14].mxu1  ;;  %v2153_v56 = vadd.f32 %v887_v55, %v2115_v14 }
 0x294   : > { %v2156_v60 = vadd.f32 %v1610_v58, %v2115_v14  ;;  %v890_v62 = vpop.f32.mrb[15].mxu1  ;;  %v952_v19 = vsel %vm455_vm1, %v2150_v54, 0.0  ;;  %v1004_v1 = vmul.f32 %v2150_v54, %v2150_v54 }
 0x295   : > { %953 = vadd.xlane.f32.xlu0 %v952_v19  ;;  %v2161_v57 = vadd.f32 %v890_v62, %v2115_v14  ;;  %v946_v9 = vsel %vm455_vm1, %v2153_v56, 0.0  ;;  %v1002_v12 = vmul.f32 %v2153_v56, %v2153_v56 }
 0x296   : > { %v955_v59 = vsel %vm455_vm1, %v2156_v60, 0.0  ;;  %v1005_v29 = vmul.f32 %v2156_v60, %v2156_v60  ;;  %v1032_v20 = vsel %vm455_vm1, %v1004_v1, 0.0 }
 0x297   : > { %956 = vadd.xlane.f32.xlu1 %v955_v59  ;;  %v949_v6 = vsel %vm455_vm1, %v2161_v57, 0.0  ;;  %v1003_v63 = vmul.f32 %v2161_v57, %v2161_v57  ;;  %v1026_v15 = vsel %vm455_vm1, %v1002_v12, 0.0 }
 0x298   : > { %v1035_v51 = vsel %vm455_vm1, %v1005_v29, 0.0 }
 0x299   : > { %947 = vadd.xlane.f32.xlu0 %v946_v9  ;;  %v1613_v50 = vpop.f32.mrb[16].mxu1  ;;  %v1029_v17 = vsel %vm455_vm1, %v1003_v63, 0.0 }
 0x29a   : > { %v903_v3 = vpop.f32.mrb[17].mxu1  ;;  %v2180_v49 = vadd.f32 %v1613_v50, %v2115_v14 }
 0x29b   : > { %950 = vadd.xlane.f32.xlu1 %v949_v6  ;;  %v1614_v61 = vpop.f32.mrb[18].mxu1  ;;  %v2188_v45 = vadd.f32 %v903_v3, %v2115_v14 }
 0x29c   : > { %v906_v16 = vpop.f32.mrb[19].mxu1  ;;  %v2184_v22 = vadd.f32 %v1614_v61, %v2115_v14  ;;  %v964_v26 = vsel %vm455_vm1, %v2180_v49, 0.0  ;;  %v1008_v28 = vmul.f32 %v2180_v49, %v2180_v49 }
 0x29d   : > { %1033 = vadd.xlane.f32.xlu0 %v1032_v20  ;;  %v2193_v46 = vadd.f32 %v906_v16, %v2115_v14  ;;  %v958_v27 = vsel %vm455_vm1, %v2188_v45, 0.0  ;;  %v1006_v32 = vmul.f32 %v2188_v45, %v2188_v45 }
 0x29e   : > { %v967_v23 = vsel %vm455_vm1, %v2184_v22, 0.0  ;;  %v1009_v5 = vmul.f32 %v2184_v22, %v2184_v22  ;;  %v1044_v30 = vsel %vm455_vm1, %v1008_v28, 0.0 }
 0x29f   : > { %1036 = vadd.xlane.f32.xlu1 %v1035_v51  ;;  %v961_v25 = vsel %vm455_vm1, %v2193_v46, 0.0  ;;  %v1007_v34 = vmul.f32 %v2193_v46, %v2193_v46  ;;  %v1038_v37 = vsel %vm455_vm1, %v1006_v32, 0.0 }
 0x2a0   : > { %v1047_v33 = vsel %vm455_vm1, %v1009_v5, 0.0 }
 0x2a1   : > { %1027 = vadd.xlane.f32.xlu0 %v1026_v15  ;;  %v1041_v42 = vsel %vm455_vm1, %v1007_v34, 0.0 }
 0x2a3   : > { %1030 = vadd.xlane.f32.xlu1 %v1029_v17 }
 0x2a4   : > { %v1617_v18 = vpop.f32.mrb[20].mxu1 }
 0x2a5   : > { %965 = vadd.xlane.f32.xlu0 %v964_v26  ;;  %v919_v53 = vpop.f32.mrb[21].mxu1  ;;  %v2215_v36 = vadd.f32 %v1617_v18, %v2115_v14 }
 0x2a6   : > { %v1618_v24 = vpop.f32.mrb[22].mxu1  ;;  %v2226_v43 = vadd.f32 %v919_v53, %v2115_v14 }
 0x2a7   : > { %968 = vadd.xlane.f32.xlu1 %v967_v23  ;;  %v922_v0 = vpop.f32.mrb[23].mxu1  ;;  %v2222_v41 = vadd.f32 %v1618_v24, %v2115_v14  ;;  %v976_v35 = vsel %vm455_vm1, %v2215_v36, 0.0  ;;  %v1012_v52 = vmul.f32 %v2215_v36, %v2215_v36 }
 0x2a8   : > { %v2234_v47 = vadd.f32 %v922_v0, %v2115_v14  ;;  %v970_v21 = vsel %vm455_vm1, %v2226_v43, 0.0  ;;  %v1010_v38 = vmul.f32 %v2226_v43, %v2226_v43 }
 0x2a9   : > { %959 = vadd.xlane.f32.xlu0 %v958_v27  ;;  %v979_v31 = vsel %vm455_vm1, %v2222_v41, 0.0  ;;  %v1013_v58 = vmul.f32 %v2222_v41, %v2222_v41  ;;  %v1056_v62 = vsel %vm455_vm1, %v1012_v52, 0.0 }
 0x2aa   : > { %v973_v14 = vsel %vm455_vm1, %v2234_v47, 0.0  ;;  %v1011_v2 = vmul.f32 %v2234_v47, %v2234_v47  ;;  %v1050_v48 = vsel %vm455_vm1, %v1010_v38, 0.0 }
 0x2ab   : > { %962 = vadd.xlane.f32.xlu1 %v961_v25  ;;  %v1059_v19 = vsel %vm455_vm1, %v1013_v58, 0.0 }
 0x2ac   : > { %v1053_v55 = vsel %vm455_vm1, %v1011_v2, 0.0  ;;  %v1212_v2 = vsub.s32 5, %v1809_v11 }
 0x2ad   : > { %1045 = vadd.xlane.f32.xlu0 %v1044_v30 }
 0x2af   : > { %1048 = vadd.xlane.f32.xlu1 %v1047_v33 }
 0x2b1   : > { %1039 = vadd.xlane.f32.xlu0 %v1038_v37 }
 0x2b3   : > { %1042 = vadd.xlane.f32.xlu1 %v1041_v42 }
 0x2b5   : > { %977 = vadd.xlane.f32.xlu0 %v976_v35 }
 0x2b7   : > { %980 = vadd.xlane.f32.xlu1 %v979_v31 }
 0x2b9   : > { %971 = vadd.xlane.f32.xlu0 %v970_v21 }
 0x2bb   : > { %974 = vadd.xlane.f32.xlu1 %v973_v14 }
 0x2bd   : > { %1051 = vadd.xlane.f32.xlu0 %v1050_v48 }
 0x2bf   : > { %1054 = vadd.xlane.f32.xlu1 %v1053_v55  ;;  %v1737_v55 = vld [vmem:[%s2434_s3] sm:$0x3f] }
 0x2c0   : > { %v2272_v58 = vrot.slane %v1737_v55, %v1192_v44 }
 0x2c1   : > { %1057 = vadd.xlane.f32.xlu0 %v1056_v62 }
 0x2c3   : > { %1060 = vadd.xlane.f32.xlu1 %v1059_v19 }
 0x30e   : > { %v942_v59 = vpop.xlane.xlu0 %941 }
 0x30f   : > { %v984_v50 = vmul.f32 0.015625, %v942_v59 }
 0x310   : > { %v945_v9 = vpop.xlane.xlu1 %944 }
 0x311   : > { %v985_v6 = vmul.f32 0.015625, %v945_v9  ;;  %v1080_v61 = vmul.f32 %v984_v50, %v984_v50  ;;  %v1128_v38 = vsub.f32 %v2118_v10, %v984_v50 }
 0x312   : > { %v936_v1 = vpop.xlane.xlu0 %935 }
 0x313   : > { %v982_v16 = vmul.f32 0.015625, %v936_v1  ;;  %v1081_v63 = vmul.f32 %v985_v6, %v985_v6  ;;  %v1129_v52 = vsub.f32 %v2124_v39, %v985_v6 }
 0x314   : > { %v939_v3 = vpop.xlane.xlu1 %938 }
 0x315   : > { %v2257_v12 = vmul.f32 0.015625, %v939_v3  ;;  %v1078_v26 = vmul.f32 %v982_v16, %v982_v16  ;;  %v1126_v11 = vsub.f32 %v2121_v7, %v982_v16 }
 0x316   : > { %v1022_v29 = vpop.xlane.xlu0 %1021 }
 0x317   : > { %v1064_v20 = vmul.f32 0.015625, %v1022_v29  ;;  %v1079_v0 = vmul.f32 %v2257_v12, %v2257_v12  ;;  %v2281_v29 = vrot.slane %v1737_v55, %v1212_v2 }
 0x318   : > { %v1025_v51 = vpop.xlane.xlu1 %1024 }
 0x319   : > { %v1096_v15 = vsub.f32 %v1064_v20, %v1080_v61  ;;  %v1065_v17 = vmul.f32 0.015625, %v1025_v51 }
 0x31a   : > { %v1016_v18 = vpop.xlane.xlu0 %1015 }
 0x31b   : > { %v1112_v53 = vmax.f32 %v1096_v15, 0.0  ;;  %v1097_v24 = vsub.f32 %v1065_v17, %v1081_v63  ;;  %v1062_v23 = vmul.f32 0.015625, %v1016_v18  ;;  %v1127_v63 = vsub.f32 %v2129_v13, %v2257_v12 }
 0x31c   : > { %v1019_v27 = vpop.xlane.xlu1 %1018 }
 0x31d   : > { %v1144_v28 = vadd.f32 1e-05, %v1112_v53  ;;  %v1113_v25 = vmax.f32 %v1097_v24, 0.0  ;;  %v1094_v5 = vsub.f32 %v1062_v23, %v1078_v26  ;;  %v1063_v30 = vmul.f32 0.015625, %v1019_v27 }
 0x31f   : > { %1705 = vrsqrt.f32 %v1144_v28  ;;  %v1145_v32 = vadd.f32 1e-05, %v1113_v25  ;;  %v1110_v4 = vmax.f32 %v1094_v5, 0.0  ;;  %v1095_v33 = vsub.f32 %v1063_v30, %v1079_v0 }
 0x321   : > { %1707 = vrsqrt.f32 %v1145_v32  ;;  %v1142_v34 = vadd.f32 1e-05, %v1110_v4  ;;  %v1111_v37 = vmax.f32 %v1095_v33, 0.0 }
 0x322   : > { %v954_v40 = vpop.xlane.xlu0 %953 }
 0x323   : > { %1709 = vrsqrt.f32 %v1142_v34  ;;  %v1143_v42 = vadd.f32 1e-05, %v1111_v37  ;;  %v2262_v21 = vmul.f32 0.015625, %v954_v40 }
 0x324   : > { %v957_v35 = vpop.xlane.xlu1 %956 }
 0x325   : > { %1711 = vrsqrt.f32 %v1143_v42  ;;  %v2266_v48 = vmul.f32 0.015625, %v957_v35  ;;  %v1084_v10 = vmul.f32 %v2262_v21, %v2262_v21 }
 0x326   : > { %v948_v31 = vpop.xlane.xlu0 %947 }
 0x327   : > { %v2276_v9 = vmul.f32 0.015625, %v948_v31  ;;  %v1085_v61 = vmul.f32 %v2266_v48, %v2266_v48 }
 0x328   : > { %v951_v8 = vpop.xlane.xlu1 %950 }
 0x329   : > { %v1706_v14 = vpop.eup %1705  ;;  %v2279_v3 = vmul.f32 0.015625, %v951_v8  ;;  %v1082_v26 = vmul.f32 %v2276_v9, %v2276_v9 }
 0x32a   : > { %v1176_v62 = vmul.f32 %v1706_v14, %v1128_v38  ;;  %v1034_v19 = vpop.xlane.xlu0 %1033 }
 0x32b   : > { %v1708_v59 = vpop.eup %1707  ;;  %v1068_v1 = vmul.f32 0.015625, %v1034_v19  ;;  %v1083_v27 = vmul.f32 %v2279_v3, %v2279_v3 }
 0x32c   : > { %v1177_v50 = vmul.f32 %v1708_v59, %v1129_v52  ;;  %v1037_v39 = vpop.xlane.xlu1 %1036  ;;  %v1196_v15 = vmul.f32 %v2272_v58, %v1176_v62 }
 0x32d   : > { %v1710_v6 = vpop.eup %1709  ;;  %v1100_v20 = vsub.f32 %v1068_v1, %v1084_v10  ;;  %v1069_v51 = vmul.f32 0.015625, %v1037_v39 }
 0x32e   : > { %v1197_v17 = vmul.f32 %v2272_v58, %v1177_v50  ;;  %v1028_v7 = vpop.xlane.xlu0 %1027  ;;  %v1174_v16 = vmul.f32 %v1710_v6, %v1126_v11  ;;  %v1216_v4 = vadd.f32 %v2281_v29, %v1196_v15 }
 0x32f   : > { %v1712_v18 = vpop.eup %1711  ;;  %v1116_v53 = vmax.f32 %v1100_v20, 0.0  ;;  %v1101_v24 = vsub.f32 %v1069_v51, %v1085_v61  ;;  %v1066_v23 = vmul.f32 0.015625, %v1028_v7  ;;  %v1132_v51 = vsub.f32 %v2150_v54, %v2262_v21 }
 0x330   : > { %v1217_v0 = vadd.f32 %v2281_v29, %v1197_v17  ;;  %v1031_v28 = vpop.xlane.xlu1 %1030  ;;  %v1175_v13 = vmul.f32 %v1712_v18, %v1127_v63  ;;  %v1194_v12 = vmul.f32 %v2272_v58, %v1174_v16  ;;  %v1232_v59 = vmax.f32 %v1216_v4, 0.0 }
 0x331   : > { %v1148_v25 = vadd.f32 1e-05, %v1116_v53  ;;  %v1117_v5 = vmax.f32 %v1101_v24, 0.0  ;;  %v1098_v30 = vsub.f32 %v1066_v23, %v1082_v26  ;;  %v1067_v32 = vmul.f32 0.015625, %v1031_v28 }
 0x332   : > { %v966_v33 = vpop.xlane.xlu0 %965  ;;  %v1195_v34 = vmul.f32 %v2272_v58, %v1175_v13  ;;  %v1214_v37 = vadd.f32 %v2281_v29, %v1194_v12  ;;  %v1233_v14 = vmax.f32 %v1217_v0, 0.0  ;;  %v1133_v26 = vsub.f32 %v2156_v60, %v2266_v48 }
 0x333   : > { %1713 = vrsqrt.f32 %v1148_v25  ;;  %v1149_v40 = vadd.f32 1e-05, %v1117_v5  ;;  %v1114_v42 = vmax.f32 %v1098_v30, 0.0  ;;  %v1099_v35 = vsub.f32 %v1067_v32, %v1083_v27 }
 0x334   : > { %v969_v44 = vpop.xlane.xlu1 %968  ;;  %v1215_v31 = vadd.f32 %v2281_v29, %v1195_v34  ;;  %v1230_v52 = vmax.f32 %v1214_v37, 0.0  ;;  %v2299_v19 = vmul.f32 0.015625, %v966_v33  ;;  %v1247_v50 = vpack.c.bf16 %v1233_v14, %v1232_v59 }
 0x335   : > { %1715 = vrsqrt.f32 %v1149_v40  ;;  %v1146_v38 = vadd.f32 1e-05, %v1114_v42  ;;  %v1115_v8 = vmax.f32 %v1099_v35, 0.0  ;;  %v2301_v11 = vmul.f32 0.015625, %v969_v44 }
 0x336   : > { %v960_v2 = vpop.xlane.xlu0 %959  ;;  %v1231_v55 = vmax.f32 %v1215_v31, 0.0  ;;  %v1088_v6 = vmul.f32 %v2299_v19, %v2299_v19  ;;  %v1130_v28 = vsub.f32 %v2153_v56, %v2276_v9  ;;  %v1131_v4 = vsub.f32 %v2161_v57, %v2279_v3 }
 0x337   : > { %1717 = vrsqrt.f32 %v1146_v38  ;;  %v1147_v62 = vadd.f32 1e-05, %v1115_v8  ;;  %v2306_v61 = vmul.f32 0.015625, %v960_v2  ;;  %v1089_v7 = vmul.f32 %v2301_v11, %v2301_v11 }
 0x338   : > { %v963_v10 = vpop.xlane.xlu1 %962  ;;  %v1246_v1 = vpack.c.bf16 %v1231_v55, %v1230_v52 }
 0x339   : > { %1719 = vrsqrt.f32 %v1147_v62  ;;  %v2311_v63 = vmul.f32 0.015625, %v963_v10  ;;  %v1086_v0 = vmul.f32 %v2306_v61, %v2306_v61 }
 0x33a   : > { %1627 = vmatprep.mubr.msk.bf16.mxu0 %vm455_vm1, %v1246_v1  ;;  %v1046_v39 = vpop.xlane.xlu0 %1045 }
 0x33b   : > { %v1072_v20 = vmul.f32 0.015625, %v1046_v39  ;;  %1628 = vmatmul.mubr.msk.bf16.vlgmr.msra.gmra.mrb[8].mxu0 %vm455_vm1, %v1247_v50  ;;  %v1087_v13 = vmul.f32 %v2311_v63, %v2311_v63 }
 0x33c   : > { %v1049_v15 = vpop.xlane.xlu1 %1048 }
 0x33d   : > { %v1714_v17 = vpop.eup %1713  ;;  %v1104_v16 = vsub.f32 %v1072_v20, %v1088_v6  ;;  %v1073_v18 = vmul.f32 0.015625, %v1049_v15 }
 0x33e   : > { %v1040_v53 = vpop.xlane.xlu0 %1039  ;;  %v1180_v24 = vmul.f32 %v1714_v17, %v1132_v51 }
 0x33f   : > { %v1716_v23 = vpop.eup %1715  ;;  %v1120_v27 = vmax.f32 %v1104_v16, 0.0  ;;  %v1105_v54 = vsub.f32 %v1073_v18, %v1089_v7  ;;  %v1070_v21 = vmul.f32 0.015625, %v1040_v53  ;;  %v1136_v18 = vsub.f32 %v2180_v49, %v2299_v19 }
 0x340   : > { %v1043_v12 = vpop.xlane.xlu1 %1042  ;;  %v1181_v25 = vmul.f32 %v1716_v23, %v1133_v26  ;;  %v1200_v37 = vmul.f32 %v2272_v58, %v1180_v24 }
 0x341   : > { %v1718_v5 = vpop.eup %1717  ;;  %v1152_v30 = vadd.f32 1e-05, %v1120_v27  ;;  %v1121_v60 = vmax.f32 %v1105_v54, 0.0  ;;  %v1102_v48 = vsub.f32 %v1070_v21, %v1086_v0  ;;  %v1071_v32 = vmul.f32 0.015625, %v1043_v12 }
 0x342   : > { %v978_v33 = vpop.xlane.xlu0 %977  ;;  %v1178_v34 = vmul.f32 %v1718_v5, %v1130_v28  ;;  %v1201_v40 = vmul.f32 %v2272_v58, %v1181_v25  ;;  %v1220_v62 = vadd.f32 %v2281_v29, %v1200_v37  ;;  %v1137_v28 = vsub.f32 %v2184_v22, %v2301_v11 }
 0x343   : > { %v1720_v56 = vpop.eup %1719  ;;  %1721 = vrsqrt.f32 %v1152_v30  ;;  %v1153_v9 = vadd.f32 1e-05, %v1121_v60  ;;  %v1118_v42 = vmax.f32 %v1102_v48, 0.0  ;;  %v1103_v35 = vsub.f32 %v1071_v32, %v1087_v13 }
 0x344   : > { %v981_v44 = vpop.xlane.xlu1 %980  ;;  %v1179_v31 = vmul.f32 %v1720_v56, %v1131_v4  ;;  %v1198_v38 = vmul.f32 %v2272_v58, %v1178_v34  ;;  %v1221_v57 = vadd.f32 %v2281_v29, %v1201_v40  ;;  %v2337_v15 = vmul.f32 0.015625, %v978_v33 }
 0x345   : > { %1723 = vrsqrt.f32 %v1153_v9  ;;  %v1150_v8 = vadd.f32 1e-05, %v1118_v42  ;;  %v1119_v14 = vmax.f32 %v1103_v35, 0.0  ;;  %v1236_v16 = vmax.f32 %v1220_v62, 0.0 }
 0x346   : > { %v972_v3 = vpop.xlane.xlu0 %971  ;;  %v1199_v2 = vmul.f32 %v2272_v58, %v1179_v31  ;;  %v1218_v52 = vadd.f32 %v2281_v29, %v1198_v38  ;;  %v1237_v39 = vmax.f32 %v1221_v57, 0.0  ;;  %v2343_v26 = vmul.f32 0.015625, %v981_v44 }
 0x347   : > { %1725 = vrsqrt.f32 %v1150_v8  ;;  %v1151_v55 = vadd.f32 1e-05, %v1119_v14  ;;  %v2332_v59 = vmul.f32 0.015625, %v972_v3  ;;  %v1092_v49 = vmul.f32 %v2337_v15, %v2337_v15 }
 0x348   : > { %v975_v10 = vpop.xlane.xlu1 %974  ;;  %v1219_v1 = vadd.f32 %v2281_v29, %v1199_v2  ;;  %v1234_v20 = vmax.f32 %v1218_v52, 0.0  ;;  %v1249_v21 = vpack.c.bf16 %v1237_v39, %v1236_v16  ;;  %v1134_v60 = vsub.f32 %v2188_v45, %v2306_v61 }
 0x349   : > { %1727 = vrsqrt.f32 %v1151_v55  ;;  %v2335_v50 = vmul.f32 0.015625, %v975_v10  ;;  %v1090_v17 = vmul.f32 %v2332_v59, %v2332_v59  ;;  %v1093_v48 = vmul.f32 %v2343_v26, %v2343_v26 }
 0x34a   : > { %v1052_v6 = vpop.xlane.xlu0 %1051  ;;  %v1235_v51 = vmax.f32 %v1219_v1, 0.0  ;;  %v1135_v40 = vsub.f32 %v2193_v46, %v2311_v63  ;;  %v1138_v39 = vsub.f32 %v2226_v43, %v2332_v59  ;;  %v1141_v43 = vsub.f32 %v2222_v41, %v2343_v26 }
 0x34b   : > { %v1074_v7 = vmul.f32 0.015625, %v1052_v6  ;;  %v1091_v0 = vmul.f32 %v2335_v50, %v2335_v50 }
 0x34c   : > { %v1055_v53 = vpop.xlane.xlu1 %1054  ;;  %v1248_v24 = vpack.c.bf16 %v1235_v51, %v1234_v20 }
 0x34d   : > { %v1722_v23 = vpop.eup %1721  ;;  %v1106_v27 = vsub.f32 %v1074_v7, %v1090_v17  ;;  %v1075_v54 = vmul.f32 0.015625, %v1055_v53  ;;  %v1139_v17 = vsub.f32 %v2234_v47, %v2335_v50 }
 0x34e   : > { %1631 = vmatprep.mubr.msk.bf16.mxu0 %vm455_vm1, %v1248_v24  ;;  %v1058_v13 = vpop.xlane.xlu0 %1057  ;;  %v1184_v12 = vmul.f32 %v1722_v23, %v1136_v18  ;;  %v1140_v18 = vsub.f32 %v2215_v36, %v2337_v15 }
 0x34f   : > { %v1724_v25 = vpop.eup %1723  ;;  %v1122_v19 = vmax.f32 %v1106_v27, 0.0  ;;  %v1107_v5 = vsub.f32 %v1075_v54, %v1091_v0  ;;  %v1076_v30 = vmul.f32 0.015625, %v1058_v13  ;;  %1632 = vmatmul.mubr.msk.bf16.gmra.mrb[12].mxu0 %vm455_vm1, %v1249_v21 }
 0x350   : > { %v1061_v22 = vpop.xlane.xlu1 %1060  ;;  %v1185_v11 = vmul.f32 %v1724_v25, %v1137_v28  ;;  %v1204_v9 = vmul.f32 %v2272_v58, %v1184_v12 }
 0x351   : > { %v1726_v32 = vpop.eup %1725  ;;  %v1154_v4 = vadd.f32 1e-05, %v1122_v19  ;;  %v1123_v33 = vmax.f32 %v1107_v5, 0.0  ;;  %v1108_v34 = vsub.f32 %v1076_v30, %v1092_v49  ;;  %v1077_v37 = vmul.f32 0.015625, %v1061_v22  ;;  %v1526_v19 = vld [vmem:[%s2436_s5] ss:$0 sm:$0xff] }
 0x352   : > { %v1182_v56 = vmul.f32 %v1726_v32, %v1134_v60  ;;  %v1205_v42 = vmul.f32 %v2272_v58, %v1185_v11  ;;  %v1224_v2 = vadd.f32 %v2281_v29, %v1204_v9 }
 0x353   : > { %v1728_v35 = vpop.eup %1727  ;;  %1729 = vrsqrt.f32 %v1154_v4  ;;  %v1155_v45 = vadd.f32 1e-05, %v1123_v33  ;;  %v1124_v61 = vmax.f32 %v1108_v34, 0.0  ;;  %v1109_v44 = vsub.f32 %v1077_v37, %v1093_v48 }
 0x354   : > { %v1183_v31 = vmul.f32 %v1728_v35, %v1135_v40  ;;  %v1202_v38 = vmul.f32 %v2272_v58, %v1182_v56  ;;  %v1225_v57 = vadd.f32 %v2281_v29, %v1205_v42  ;;  %v1240_v1 = vmax.f32 %v1224_v2, 0.0 }
 0x355   : > { %1731 = vrsqrt.f32 %v1155_v45  ;;  %v1156_v8 = vadd.f32 1e-05, %v1124_v61  ;;  %v1125_v14 = vmax.f32 %v1109_v44, 0.0 }
 0x356   : > { %v1203_v46 = vmul.f32 %v2272_v58, %v1183_v31  ;;  %v1222_v63 = vadd.f32 %v2281_v29, %v1202_v38  ;;  %v1241_v55 = vmax.f32 %v1225_v57, 0.0 }
 0x357   : > { %1733 = vrsqrt.f32 %v1156_v8  ;;  %v1157_v3 = vadd.f32 1e-05, %v1125_v14 }
 0x358   : > { %v1223_v52 = vadd.f32 %v2281_v29, %v1203_v46  ;;  %v1238_v62 = vmax.f32 %v1222_v63, 0.0  ;;  %v1251_v51 = vpack.c.bf16 %v1241_v55, %v1240_v1 }
 0x359   : > { %1735 = vrsqrt.f32 %v1157_v3 }
 0x35a   : > { %v1239_v10 = vmax.f32 %v1223_v52, 0.0 }
 0x35c   : > { %v1250_v6 = vpack.c.bf16 %v1239_v10, %v1238_v62 }
 0x35d   : > { %v1730_v20 = vpop.eup %1729 }
 0x35e   : > { %1635 = vmatprep.mubr.msk.bf16.mxu0 %vm455_vm1, %v1250_v6  ;;  %v1186_v7 = vmul.f32 %v1730_v20, %v1138_v39 }
 0x35f   : > { %v1732_v16 = vpop.eup %1731  ;;  %1636 = vmatmul.mubr.msk.bf16.gmra.mrb[16].mxu0 %vm455_vm1, %v1251_v51 }
 0x360   : > { %v1187_v53 = vmul.f32 %v1732_v16, %v1139_v17  ;;  %v1206_v24 = vmul.f32 %v2272_v58, %v1186_v7 }
 0x361   : > { %v1734_v23 = vpop.eup %1733 }
 0x362   : > { %v1207_v59 = vmul.f32 %v2272_v58, %v1187_v53  ;;  %v1226_v47 = vadd.f32 %v2281_v29, %v1206_v24  ;;  %v1188_v50 = vmul.f32 %v1734_v23, %v1140_v18 }
 0x363   : > { %v1736_v0 = vpop.eup %1735 }
 0x364   : > { %v1227_v27 = vadd.f32 %v2281_v29, %v1207_v59  ;;  %v1189_v54 = vmul.f32 %v1736_v0, %v1141_v43  ;;  %v1208_v21 = vmul.f32 %v2272_v58, %v1188_v50  ;;  %v1242_v36 = vmax.f32 %v1226_v47, 0.0 }
 0x366   : > { %v1243_v15 = vmax.f32 %v1227_v27, 0.0  ;;  %v1209_v28 = vmul.f32 %v2272_v58, %v1189_v54  ;;  %v1228_v13 = vadd.f32 %v2281_v29, %v1208_v21 }
 0x368   : > { %v1252_v12 = vpack.c.bf16 %v1243_v15, %v1242_v36  ;;  %v1229_v41 = vadd.f32 %v2281_v29, %v1209_v28  ;;  %v1244_v26 = vmax.f32 %v1228_v13, 0.0 }
 0x36a   : > { %1639 = vmatprep.mubr.msk.bf16.mxu0 %vm455_vm1, %v1252_v12  ;;  %v1245_v25 = vmax.f32 %v1229_v41, 0.0 }
 0x36c   : > { %v1253_v49 = vpack.c.bf16 %v1245_v25, %v1244_v26 }
 0x36e   : > { %1640 = vmatmul.mubr.msk.bf16.gmra.mrb[20].mxu0 %vm455_vm1, %v1253_v49 }
 0x40e   : > { %v1629_v58 = vpop.f32.mrb[8].mxu0 }
 0x40f   : > { %v1360_v29 = vadd.f32 %v1629_v58, %v1526_v19  ;;  %v1351_v5 = vpop.f32.mrb[9].mxu0 }
 0x410   : > { %v1352_v30 = vadd.f32 %v1526_v19, %v1351_v5  ;;  %v1630_v60 = vpop.f32.mrb[10].mxu0 }
 0x411   : > { %1417 = vst.msk [vmem:[%s2394_s11 + $0x10] sm:$0xff] %vm1414_vm2, %v1360_v29  ;;  %v1363_v48 = vadd.f32 %v1630_v60, %v1526_v19  ;;  %v1354_v22 = vpop.f32.mrb[11].mxu0 }
 0x412   : > { %1415 = vst.msk [vmem:[%s2394_s11] sm:$0xff] %vm1414_vm2, %v1352_v30  ;;  %v1355_v11 = vadd.f32 %v1526_v19, %v1354_v22 }
 0x413   : > { %1418 = vst.msk [vmem:[%s2394_s11 + $0x18] sm:$0xff] %vm1414_vm2, %v1363_v48 }
 0x414   : > { %1416 = vst.msk [vmem:[%s2394_s11 + $0x8] sm:$0xff] %vm1414_vm2, %v1355_v11 }
 0x422   : > { %v1633_v32 = vpop.f32.mrb[12].mxu0 }
 0x423   : > { %v1376_v4 = vadd.f32 %v1633_v32, %v1526_v19  ;;  %v1367_v33 = vpop.f32.mrb[13].mxu0 }
 0x424   : > { %v1368_v34 = vadd.f32 %v1526_v19, %v1367_v33  ;;  %v1634_v37 = vpop.f32.mrb[14].mxu0 }
 0x425   : > { %1421 = vst.msk [vmem:[%s2394_s11 + $0x30] sm:$0xff] %vm1414_vm2, %v1376_v4  ;;  %v1379_v40 = vadd.f32 %v1634_v37, %v1526_v19  ;;  %v1370_v56 = vpop.f32.mrb[15].mxu0 }
 0x426   : > { %1419 = vst.msk [vmem:[%s2394_s11 + $0x20] sm:$0xff] %vm1414_vm2, %v1368_v34  ;;  %v1371_v9 = vadd.f32 %v1526_v19, %v1370_v56 }
 0x427   : > { %1422 = vst.msk [vmem:[%s2394_s11 + $0x38] sm:$0xff] %vm1414_vm2, %v1379_v40 }
 0x428   : > { %1420 = vst.msk [vmem:[%s2394_s11 + $0x28] sm:$0xff] %vm1414_vm2, %v1371_v9 }
 0x432   : > { %v1637_v42 = vpop.f32.mrb[16].mxu0 }
 0x433   : > { %v1392_v35 = vadd.f32 %v1637_v42, %v1526_v19  ;;  %v1383_v45 = vpop.f32.mrb[17].mxu0 }
 0x434   : > { %v1384_v61 = vadd.f32 %v1526_v19, %v1383_v45  ;;  %v1638_v44 = vpop.f32.mrb[18].mxu0 }
 0x435   : > { %1425 = vst.msk [vmem:[%s2394_s11 + $0x50] sm:$0xff] %vm1414_vm2, %v1392_v35  ;;  %v1395_v31 = vadd.f32 %v1638_v44, %v1526_v19  ;;  %v1386_v38 = vpop.f32.mrb[19].mxu0 }
 0x436   : > { %1423 = vst.msk [vmem:[%s2394_s11 + $0x40] sm:$0xff] %vm1414_vm2, %v1384_v61  ;;  %v1387_v8 = vadd.f32 %v1526_v19, %v1386_v38 }
 0x437   : > { %1426 = vst.msk [vmem:[%s2394_s11 + $0x58] sm:$0xff] %vm1414_vm2, %v1395_v31 }
 0x438   : > { %1424 = vst.msk [vmem:[%s2394_s11 + $0x48] sm:$0xff] %vm1414_vm2, %v1387_v8 }
 0x441   : > { %v1641_v14 = vpop.f32.mrb[20].mxu0 }
 0x442   : > { %v1408_v57 = vadd.f32 %v1641_v14, %v1526_v19  ;;  %v1399_v46 = vpop.f32.mrb[21].mxu0 }
 0x443   : > { %v1400_v63 = vadd.f32 %v1526_v19, %v1399_v46  ;;  %v1642_v3 = vpop.f32.mrb[22].mxu0 }
 0x444   : > { %1429 = vst.msk [vmem:[%s2394_s11 + $0x70] sm:$0xff] %vm1414_vm2, %v1408_v57  ;;  %v1411_v2 = vadd.f32 %v1642_v3, %v1526_v19  ;;  %v1402_v52 = vpop.f32.mrb[23].mxu0 }
 0x445   : > { %1427 = vst.msk [vmem:[%s2394_s11 + $0x60] sm:$0xff] %vm1414_vm2, %v1400_v63  ;;  %v1403_v55 = vadd.f32 %v1526_v19, %v1402_v52 }
 0x446   : > { %1430 = vst.msk [vmem:[%s2394_s11 + $0x78] sm:$0xff] %vm1414_vm2, %v1411_v2 }
 0x447   : > { %1428 = vst.msk [vmem:[%s2394_s11 + $0x68] sm:$0xff] %vm1414_vm2, %v1403_v55 }
 0x448 PF: > { %s16_s21 = sadd.s32 1, %s1744_s21  }
 0x449   : > { %p13_p4 = scmp.ge.s32.totalorder %s16_s21, 6  }
 0x44b   :  { %15 = sbr.rel (!%p13_p4) target bundleno = 1 (0x1), region = 74 }

</bundles_post_ra>
